<compile_context>
chip_gen: v6e
topology: v6e:2x2x1
jax: 0.10.0
libtpu: 0.0.40
codegen_flags: <defaults>
</compile_context>

<pallas_src>
import jax
import jax.numpy as jnp
from jax.experimental import pallas as pl
from jax.experimental.pallas import tpu as pltpu

# ---- QuadLoss / component-loss defaults -------------------------------------
SCALE_FACTOR = 1.0      # negative_binom_loss(scale_factor=1.0)
NB_EPS = 1e-10          # negative_binom_loss(eps=1e-10)
THETA_MAX = 1.0e6       # torch.clamp(theta, max=1e6)
LOSS2_WEIGHT = 3.0      # QuadLoss(loss2_weight=3.0)
CROSS_WEIGHT = 1.0      # NullWarmup(t_max=cross_weight=1.0) -> constant 1.0
LINK_STRENGTH = 0.0     # QuadLoss(link_strength=0.0) -> link term skipped

_LANES = 128
_MAX_TILE_ROWS = 2048           # (2048,128) f32 = 1 MiB per input block
_LOG_SQRT_2PI = 0.9189385332046727
_STIRLING_SHIFT = 7.0


# ---- elementwise math (VPU/EUP inside the kernels) ----------------------------
def _lgamma(x):
    """log-Gamma for x > 0: branchless shift-to-threshold + Stirling series.

    EUP cost per element: 2 logs + 1 divide (the previous Lanczos form used
    8 divides + 2-3 logs).  The shift loop is pure VPU filler that hides under
    the EUP-bound critical path.  |err| < ~1e-5 absolute over (0, 1e7].
    """
    z = x
    p = jnp.ones_like(x)
    for _ in range(7):                      # unrolled; afterwards z >= 7 for any x > 0
        shift = z < _STIRLING_SHIFT
        p = jnp.where(shift, p * z, p)      # lgamma(x) = lgamma(z) - log(p)
        z = jnp.where(shift, z + 1.0, z)
    r = 1.0 / z
    r2 = r * r
    series = r * (1.0 / 12.0 + r2 * (-1.0 / 360.0 + r2 * (1.0 / 1260.0)))
    return (z - 0.5) * jnp.log(z) - z + _LOG_SQRT_2PI + series - jnp.log(p)


def _nb_elem(mu, theta, y, lgamma_y1):
    """Per-element negative-binomial NLL (theislab/dca); lgamma(y+1) passed in."""
    mu = mu * SCALE_FACTOR
    th = jnp.minimum(theta, THETA_MAX)
    th_e = th + NB_EPS
    log_th = jnp.log(th_e)
    t1 = _lgamma(th_e) + lgamma_y1 - _lgamma(y + th_e)
    # log1p(mu/(th+eps)) == log(th+eps+mu) - log(th+eps): reuses log(th+eps) and
    # drops one EUP divide.  (Slightly less accurate than log1p when mu << theta;
    # well within the module's tolerance for realistic inputs.)
    t2 = (th + y) * (jnp.log(th_e + mu) - log_th) + y * (log_th - jnp.log(mu + NB_EPS))
    return t1 + t2


def _bce_elem(p, t):
    """Per-element binary cross entropy with torch's -100 log clamp."""
    log_p = jnp.maximum(jnp.log(p), -100.0)
    log_q = jnp.maximum(jnp.log(1.0 - p), -100.0)
    return -(t * log_p + (1.0 - t) * log_q)


# ---- generic lane-dense tiled sum-reduction kernel ----------------------------
def _make_sum_kernel(elem_fn, n_valid, tile_rows, tpc, n_splits, needs_mask):
    full_rows = n_valid // _LANES       # rows that are entirely valid
    rem = n_valid % _LANES              # valid lanes in the final partial row

    def kernel(*refs):
        in_refs, out_ref, acc_ref = refs[:-2], refs[-2], refs[-1]
        c = pl.program_id(0)            # TensorCore split ("parallel")
        i = pl.program_id(1)            # reduction steps   ("arbitrary")

        @pl.when(i == 0)
        def _init():
            acc_ref[...] = jnp.zeros_like(acc_ref)

        v = elem_fn(*[r[...].astype(jnp.float32) for r in in_refs])

        if needs_mask:
            # Only the globally-last block can contain padded lanes / ragged rows.
            is_last = (c == n_splits - 1) & (i == tpc - 1)

            @pl.when(jnp.logical_not(is_last))
            def _acc_full():
                acc_ref[...] = acc_ref[...] + v

            @pl.when(is_last)
            def _acc_masked():
                gb = c * tpc + i
                grow = gb * tile_rows + jax.lax.broadcasted_iota(jnp.int32, v.shape, 0)
                lane = jax.lax.broadcasted_iota(jnp.int32, v.shape, 1)
                valid = grow < full_rows          # row-based index: no i32 overflow
                if rem:
                    valid = valid | ((grow == full_rows) & (lane < rem))
                acc_ref[...] = acc_ref[...] + jnp.where(valid, v, 0.0)
        else:
            acc_ref[...] = acc_ref[...] + v

        @pl.when(i == tpc - 1)
        def _finalize():
            # Single cross-lane reduce per core, broadcast into a tile-aligned block.
            out_ref[...] = jnp.broadcast_to(jnp.sum(acc_ref[...]), out_ref.shape)

    return kernel


def _tiled_sum(elem_fn, arrays, pad_values, *, max_tile_rows=_MAX_TILE_ROWS,
               flops_per_elem, trans_per_elem):
    """sum(elem_fn(*arrays)) over all elements via a lane-dense tiled Pallas reduction."""
    n = int(arrays[0].size)
    rows = -(-n // _LANES)
    lane_pad = rows * _LANES - n

    blocks = []
    for a, pad in zip(arrays, pad_values):
        flat = a.reshape(-1)            # no astype: the kernel casts per block
        if lane_pad:
            # TODO(synk): this pad copies the tensor once when n % 128 != 0; a fully
            # copy-free path would tile the natural 2-D shape instead of a flat view.
            flat = jnp.concatenate([flat, jnp.full((lane_pad,), pad, flat.dtype)])
        blocks.append(flat.reshape(rows, _LANES))

    if rows <= max_tile_rows:
        tile_rows = rows                            # single block == full array dims
    else:
        tile_rows = max(8, (max_tile_rows // 8) * 8)
    nblocks = -(-rows // tile_rows)
    # Shard across both TensorCores on v7x (harmless loop split on 1-TC v5e/v6e).
    n_splits = 2 if (nblocks >= 2 and nblocks % 2 == 0) else 1
    tpc = nblocks // n_splits                       # tiles per core
    needs_mask = n_splits * tpc * tile_rows * _LANES != n

    kernel = _make_sum_kernel(elem_fn, n, tile_rows, tpc, n_splits, needs_mask)
    bytes_accessed = (sum(int(a.size) * a.dtype.itemsize for a in arrays)
                      + n_splits * 8 * _LANES * 4)

    out = pl.pallas_call(
        kernel,
        out_shape=jax.ShapeDtypeStruct((n_splits, 8, _LANES), jnp.float32),
        grid=(n_splits, tpc),
        in_specs=[pl.BlockSpec((tile_rows, _LANES), lambda c, i: (c * tpc + i, 0))
                  for _ in blocks],
        out_specs=pl.BlockSpec((1, 8, _LANES), lambda c, i: (c, 0, 0)),
        scratch_shapes=[pltpu.VMEM((tile_rows, _LANES), jnp.float32)],
        compiler_params=pltpu.CompilerParams(
            dimension_semantics=("parallel", "arbitrary")),
        cost_estimate=pl.CostEstimate(
            flops=int(flops_per_elem) * n,
            transcendentals=int(trans_per_elem) * n,
            bytes_accessed=int(bytes_accessed)),
    )(*blocks)
    return jnp.sum(out[:, 0, 0])


# ---- fused pair sums (one HBM pass per tensor) --------------------------------
def negative_binomial_pair_sum(mean_a, theta_a, mean_b, theta_b, truth, *,
                               weight_b=1.0, max_tile_rows=_MAX_TILE_ROWS):
    """sum over elements of NB(mean_a,theta_a;y) + weight_b * NB(mean_b,theta_b;y)."""
    def elem(mu_a, th_a, mu_b, th_b, y):
        lg_y1 = _lgamma(y + 1.0)                    # shared between the two NB terms
        second = _nb_elem(mu_b, th_b, y, lg_y1)
        if weight_b != 1.0:
            second = weight_b * second
        return _nb_elem(mu_a, th_a, y, lg_y1) + second
    return _tiled_sum(elem, (mean_a, theta_a, mean_b, theta_b, truth),
                      (0.0, 1.0, 0.0, 1.0, 0.0),    # NB(mu=0, theta=1, y=0) == 0
                      max_tile_rows=max_tile_rows,
                      flops_per_elem=260, trans_per_elem=22)


def bce_pair_sum(p_a, p_b, truth, *, weight_b=1.0, max_tile_rows=_MAX_TILE_ROWS):
    """sum over elements of BCE(p_a;t) + weight_b * BCE(p_b;t)."""
    def elem(pa, pb, t):
        second = _bce_elem(pb, t)
        if weight_b != 1.0:
            second = weight_b * second
        return _bce_elem(pa, t) + second
    return _tiled_sum(elem, (p_a, p_b, truth),
                      (1.0, 1.0, 1.0),              # BCE(p=1, t=1) == 0
                      max_tile_rows=max_tile_rows,
                      flops_per_elem=20, trans_per_elem=4)


# ---- standalone component losses (API parity with the module) -----------------
def negative_binomial_loss(preds, theta, truth):
    def elem(mu, th, y):
        return _nb_elem(mu, th, y, _lgamma(y + 1.0))
    s = _tiled_sum(elem, (preds, theta, truth), (0.0, 1.0, 0.0),
                   flops_per_elem=140, trans_per_elem=12)
    return s / jnp.float32(int(truth.size))


def bce_loss(probs, truth):
    s = _tiled_sum(_bce_elem, (probs, truth), (1.0, 1.0),
                   flops_per_elem=10, trans_per_elem=2)
    return s / jnp.float32(int(truth.size))


# ---- QuadLoss.forward ----------------------------------------------------------
def quad_loss(preds, target):
    """QuadLoss.forward with default hyper-parameters.

    preds = (preds11, preds12, preds21, preds22); preds11/preds21 = (nb_mean, nb_theta, ...),
    preds12/preds22 = (bce_probs, ...). target is (target1, target2) or a single tensor
    split at preds11[0].shape[-1] along the last axis (as in get_component_losses).
    """
    preds11, preds12, preds21, preds22 = preds
    if not isinstance(target, (list, tuple)):
        d1 = preds11[0].shape[-1]
        target1, target2 = target[..., :d1], target[..., d1:]
    else:
        target1, target2 = target

    # loss = loss11 + cross*loss21 + loss2_weight*(loss22 + cross*loss12)
    nb_sum = negative_binomial_pair_sum(preds11[0], preds11[1],
                                        preds21[0], preds21[1], target1,
                                        weight_b=CROSS_WEIGHT)
    bce_sum = bce_pair_sum(preds22[0], preds12[0], target2, weight_b=CROSS_WEIGHT)

    loss = (nb_sum / jnp.float32(int(target1.size))
            + LOSS2_WEIGHT * (bce_sum / jnp.float32(int(target2.size))))
    # TODO(synk): link term (link_strength > 0) and l1_lambda encoded-L1 penalty are
    # disabled by QuadLoss defaults; if enabled they are tiny jnp reductions here.
    return loss


# ---- pure-JAX reference (torch semantics) -------------------------------------
def _reference_quad_loss(preds, target):
    preds11, preds12, preds21, preds22 = preds
    target1, target2 = target

    def nb_ref(mu, theta, y):
        mu = mu.astype(jnp.float32) * SCALE_FACTOR
        th = jnp.minimum(theta.astype(jnp.float32), THETA_MAX)
        y = y.astype(jnp.float32)
        t1 = (jax.lax.lgamma(th + NB_EPS) + jax.lax.lgamma(y + 1.0)
              - jax.lax.lgamma(y + th + NB_EPS))
        t2 = ((th + y) * jnp.log1p(mu / (th + NB_EPS))
              + y * (jnp.log(th + NB_EPS) - jnp.log(mu + NB_EPS)))
        return jnp.mean(t1 + t2)

    def bce_ref(p, t):
        p = p.astype(jnp.float32)
        t = t.astype(jnp.float32)
        lp = jnp.maximum(jnp.log(p), -100.0)
        lq = jnp.maximum(jnp.log(1.0 - p), -100.0)
        return jnp.mean(-(t * lp + (1.0 - t) * lq))

    l11 = nb_ref(preds11[0], preds11[1], target1)
    l21 = nb_ref(preds21[0], preds21[1], target1)
    l12 = bce_ref(preds12[0], target2)
    l22 = bce_ref(preds22[0], target2)
    return l11 + LOSS2_WEIGHT * l22 + CROSS_WEIGHT * (l21 + LOSS2_WEIGHT * l12)


if __name__ == "__main__":
    key = jax.random.PRNGKey(0)
    ks = jax.random.split(key, 8)

    # D2 deliberately NOT a multiple of 128 to exercise the lane-pad + masked-tail path.
    B, D1, D2 = 8, 256, 200

    # NB heads: positive means + dispersions, non-negative count targets.
    mean11 = jnp.exp(0.5 * jax.random.normal(ks[0], (B, D1), dtype=jnp.float32))
    theta11 = jnp.exp(0.5 * jax.random.normal(ks[1], (B, D1), dtype=jnp.float32))
    mean21 = jnp.exp(0.5 * jax.random.normal(ks[2], (B, D1), dtype=jnp.float32))
    theta21 = jnp.exp(0.5 * jax.random.normal(ks[3], (B, D1), dtype=jnp.float32))
    target1 = jnp.floor(jnp.exp(jax.random.normal(ks[4], (B, D1), dtype=jnp.float32)))

    # BCE heads: probabilities in (0,1), binary targets.
    p12 = jax.nn.sigmoid(jax.random.normal(ks[5], (B, D2), dtype=jnp.float32))
    p22 = jax.nn.sigmoid(jax.random.normal(ks[6], (B, D2), dtype=jnp.float32))
    target2 = (jax.random.uniform(ks[7], (B, D2)) > 0.5).astype(jnp.float32)

    preds = ((mean11, theta11), (p12,), (mean21, theta21), (p22,))
    target = (target1, target2)

    loss = jax.block_until_ready(quad_loss(preds, target))
    ref = jax.block_until_ready(_reference_quad_loss(preds, target))
    assert jnp.allclose(loss, ref, rtol=1e-3, atol=1e-3), (loss, ref)
    # TODO(synk): torch's debug asserts raise inside forward on NaN/Inf; no traced-value
    # raise exists in Pallas, so the finiteness check is done host-side here.
    assert bool(jnp.isfinite(loss)), "NaN/Inf in loss"

    # Also exercise the multi-block, 2-TensorCore-split and ragged-last-block paths
    # (small max_tile_rows forces several blocks at these tiny shapes).
    nb_s = negative_binomial_pair_sum(mean11, theta11, mean21, theta21, target1,
                                      weight_b=CROSS_WEIGHT, max_tile_rows=8)
    bce_s = bce_pair_sum(p22, p12, target2, weight_b=CROSS_WEIGHT, max_tile_rows=8)
    loss_split = (nb_s / jnp.float32(int(target1.size))
                  + LOSS2_WEIGHT * (bce_s / jnp.float32(int(target2.size))))
    loss_split = jax.block_until_ready(loss_split)
    assert jnp.allclose(loss_split, ref, rtol=1e-3, atol=1e-3), (loss_split, ref)

    print("KERNEL_OK")
</pallas_src>

<mosaic_0001>
module attributes {stable_mosaic.version = 11 : i64} {
  func.func @kernel(%arg0: i32, %arg1: i32, %arg2: memref<16x128xf32, #tpu.memory_space<vmem>>, %arg3: memref<16x128xf32, #tpu.memory_space<vmem>>, %arg4: memref<16x128xf32, #tpu.memory_space<vmem>>, %arg5: memref<16x128xf32, #tpu.memory_space<vmem>>, %arg6: memref<16x128xf32, #tpu.memory_space<vmem>>, %arg7: memref<1x8x128xf32, #tpu.memory_space<vmem>>, %arg8: memref<16x128xf32, #tpu.memory_space<vmem>>) attributes {dimension_semantics = [#tpu.dimension_semantics<parallel>, #tpu.dimension_semantics<arbitrary>], iteration_bounds = array<i64: 1, 1>, scalar_prefetch = 0 : i64, scratch_operands = 1 : i64, tpu.core_type = #tpu.core_type<tc>, window_params = [{transform_indices = @transform_0, window_bounds = array<i64: 16, 128>}, {transform_indices = @transform_1, window_bounds = array<i64: 16, 128>}, {transform_indices = @transform_2, window_bounds = array<i64: 16, 128>}, {transform_indices = @transform_3, window_bounds = array<i64: 16, 128>}, {transform_indices = @transform_4, window_bounds = array<i64: 16, 128>}, {transform_indices = @transform_5, window_bounds = array<i64: 1, 8, 128>}]} {
    %c0_i32 = arith.constant 0 : i32
    %0 = arith.cmpi eq, %arg1, %c0_i32 : i32
    %1 = arith.extui %0 : i1 to i32
    %c0_i32_0 = arith.constant 0 : i32
    %2 = arith.cmpi ne, %1, %c0_i32_0 : i32
    scf.if %2 {
      %cst_129 = arith.constant 0.000000e+00 : f32
      %416 = vector.broadcast %cst_129 : f32 to vector<16x128xf32>
      %c0_130 = arith.constant 0 : index
      %c0_131 = arith.constant 0 : index
      %417 = vector.load %arg8[%c0_130, %c0_131] : memref<16x128xf32, #tpu.memory_space<vmem>>, vector<16x128xf32>
      tpu.vector_store %arg8[%c0_130, %c0_131], %416 {strides = array<i32>} : memref<16x128xf32, #tpu.memory_space<vmem>>, vector<16x128xf32>,
    } else {
    }
    %c0 = arith.constant 0 : index
    %c0_1 = arith.constant 0 : index
    %3 = vector.load %arg2[%c0, %c0_1] : memref<16x128xf32, #tpu.memory_space<vmem>>, vector<16x128xf32>
    %c0_2 = arith.constant 0 : index
    %c0_3 = arith.constant 0 : index
    %4 = vector.load %arg3[%c0_2, %c0_3] : memref<16x128xf32, #tpu.memory_space<vmem>>, vector<16x128xf32>
    %c0_4 = arith.constant 0 : index
    %c0_5 = arith.constant 0 : index
    %5 = vector.load %arg4[%c0_4, %c0_5] : memref<16x128xf32, #tpu.memory_space<vmem>>, vector<16x128xf32>
    %c0_6 = arith.constant 0 : index
    %c0_7 = arith.constant 0 : index
    %6 = vector.load %arg5[%c0_6, %c0_7] : memref<16x128xf32, #tpu.memory_space<vmem>>, vector<16x128xf32>
    %c0_8 = arith.constant 0 : index
    %c0_9 = arith.constant 0 : index
    %7 = vector.load %arg6[%c0_8, %c0_9] : memref<16x128xf32, #tpu.memory_space<vmem>>, vector<16x128xf32>
    %cst = arith.constant 1.000000e+00 : f32
    %8 = vector.broadcast %cst : f32 to vector<16x128xf32>
    %9 = arith.addf %7, %8 : vector<16x128xf32>
    %cst_10 = arith.constant 1.000000e+00 : f32
    %10 = vector.broadcast %cst_10 : f32 to vector<16x128xf32>
    %cst_11 = arith.constant 7.000000e+00 : f32
    %11 = vector.broadcast %cst_11 : f32 to vector<16x128xf32>
    %12 = arith.cmpf olt, %9, %11 : vector<16x128xf32>
    %13 = arith.mulf %10, %9 : vector<16x128xf32>
    %14 = arith.select %12, %13, %10 : vector<16x128xi1>, vector<16x128xf32>
    %cst_12 = arith.constant 1.000000e+00 : f32
    %15 = vector.broadcast %cst_12 : f32 to vector<16x128xf32>
    %16 = arith.addf %9, %15 : vector<16x128xf32>
    %17 = arith.select %12, %16, %9 : vector<16x128xi1>, vector<16x128xf32>
    %cst_13 = arith.constant 7.000000e+00 : f32
    %18 = vector.broadcast %cst_13 : f32 to vector<16x128xf32>
    %19 = arith.cmpf olt, %17, %18 : vector<16x128xf32>
    %20 = arith.mulf %14, %17 : vector<16x128xf32>
    %21 = arith.select %19, %20, %14 : vector<16x128xi1>, vector<16x128xf32>
    %cst_14 = arith.constant 1.000000e+00 : f32
    %22 = vector.broadcast %cst_14 : f32 to vector<16x128xf32>
    %23 = arith.addf %17, %22 : vector<16x128xf32>
    %24 = arith.select %19, %23, %17 : vector<16x128xi1>, vector<16x128xf32>
    %cst_15 = arith.constant 7.000000e+00 : f32
    %25 = vector.broadcast %cst_15 : f32 to vector<16x128xf32>
    %26 = arith.cmpf olt, %24, %25 : vector<16x128xf32>
    %27 = arith.mulf %21, %24 : vector<16x128xf32>
    %28 = arith.select %26, %27, %21 : vector<16x128xi1>, vector<16x128xf32>
    %cst_16 = arith.constant 1.000000e+00 : f32
    %29 = vector.broadcast %cst_16 : f32 to vector<16x128xf32>
    %30 = arith.addf %24, %29 : vector<16x128xf32>
    %31 = arith.select %26, %30, %24 : vector<16x128xi1>, vector<16x128xf32>
    %cst_17 = arith.constant 7.000000e+00 : f32
    %32 = vector.broadcast %cst_17 : f32 to vector<16x128xf32>
    %33 = arith.cmpf olt, %31, %32 : vector<16x128xf32>
    %34 = arith.mulf %28, %31 : vector<16x128xf32>
    %35 = arith.select %33, %34, %28 : vector<16x128xi1>, vector<16x128xf32>
    %cst_18 = arith.constant 1.000000e+00 : f32
    %36 = vector.broadcast %cst_18 : f32 to vector<16x128xf32>
    %37 = arith.addf %31, %36 : vector<16x128xf32>
    %38 = arith.select %33, %37, %31 : vector<16x128xi1>, vector<16x128xf32>
    %cst_19 = arith.constant 7.000000e+00 : f32
    %39 = vector.broadcast %cst_19 : f32 to vector<16x128xf32>
    %40 = arith.cmpf olt, %38, %39 : vector<16x128xf32>
    %41 = arith.mulf %35, %38 : vector<16x128xf32>
    %42 = arith.select %40, %41, %35 : vector<16x128xi1>, vector<16x128xf32>
    %cst_20 = arith.constant 1.000000e+00 : f32
    %43 = vector.broadcast %cst_20 : f32 to vector<16x128xf32>
    %44 = arith.addf %38, %43 : vector<16x128xf32>
    %45 = arith.select %40, %44, %38 : vector<16x128xi1>, vector<16x128xf32>
    %cst_21 = arith.constant 7.000000e+00 : f32
    %46 = vector.broadcast %cst_21 : f32 to vector<16x128xf32>
    %47 = arith.cmpf olt, %45, %46 : vector<16x128xf32>
    %48 = arith.mulf %42, %45 : vector<16x128xf32>
    %49 = arith.select %47, %48, %42 : vector<16x128xi1>, vector<16x128xf32>
    %cst_22 = arith.constant 1.000000e+00 : f32
    %50 = vector.broadcast %cst_22 : f32 to vector<16x128xf32>
    %51 = arith.addf %45, %50 : vector<16x128xf32>
    %52 = arith.select %47, %51, %45 : vector<16x128xi1>, vector<16x128xf32>
    %cst_23 = arith.constant 7.000000e+00 : f32
    %53 = vector.broadcast %cst_23 : f32 to vector<16x128xf32>
    %54 = arith.cmpf olt, %52, %53 : vector<16x128xf32>
    %55 = arith.mulf %49, %52 : vector<16x128xf32>
    %56 = arith.select %54, %55, %49 : vector<16x128xi1>, vector<16x128xf32>
    %cst_24 = arith.constant 1.000000e+00 : f32
    %57 = vector.broadcast %cst_24 : f32 to vector<16x128xf32>
    %58 = arith.addf %52, %57 : vector<16x128xf32>
    %59 = arith.select %54, %58, %52 : vector<16x128xi1>, vector<16x128xf32>
    %cst_25 = arith.constant 1.000000e+00 : f32
    %60 = vector.broadcast %cst_25 : f32 to vector<16x128xf32>
    %61 = arith.divf %60, %59 : vector<16x128xf32>
    %62 = arith.mulf %61, %61 : vector<16x128xf32>
    %cst_26 = arith.constant 7.93650805E-4 : f32
    %63 = vector.broadcast %cst_26 : f32 to vector<16x128xf32>
    %64 = arith.mulf %62, %63 : vector<16x128xf32>
    %cst_27 = arith.constant -0.00277777785 : f32
    %65 = vector.broadcast %cst_27 : f32 to vector<16x128xf32>
    %66 = arith.addf %65, %64 : vector<16x128xf32>
    %67 = arith.mulf %62, %66 : vector<16x128xf32>
    %cst_28 = arith.constant 0.0833333358 : f32
    %68 = vector.broadcast %cst_28 : f32 to vector<16x128xf32>
    %69 = arith.addf %68, %67 : vector<16x128xf32>
    %70 = arith.mulf %61, %69 : vector<16x128xf32>
    %cst_29 = arith.constant 5.000000e-01 : f32
    %71 = vector.broadcast %cst_29 : f32 to vector<16x128xf32>
    %72 = arith.subf %59, %71 : vector<16x128xf32>
    %73 = math.log %59 : vector<16x128xf32>
    %74 = arith.mulf %72, %73 : vector<16x128xf32>
    %75 = arith.subf %74, %59 : vector<16x128xf32>
    %cst_30 = arith.constant 0.918938517 : f32
    %76 = vector.broadcast %cst_30 : f32 to vector<16x128xf32>
    %77 = arith.addf %75, %76 : vector<16x128xf32>
    %78 = arith.addf %77, %70 : vector<16x128xf32>
    %79 = math.log %56 : vector<16x128xf32>
    %80 = arith.subf %78, %79 : vector<16x128xf32>
    %cst_31 = arith.constant 1.000000e+00 : f32
    %81 = vector.broadcast %cst_31 : f32 to vector<16x128xf32>
    %82 = arith.mulf %5, %81 : vector<16x128xf32>
    %cst_32 = arith.constant 1.000000e+06 : f32
    %83 = vector.broadcast %cst_32 : f32 to vector<16x128xf32>
    %84 = arith.minimumf %6, %83 : vector<16x128xf32>
    %cst_33 = arith.constant 1.000000e-10 : f32
    %85 = vector.broadcast %cst_33 : f32 to vector<16x128xf32>
    %86 = arith.addf %84, %85 : vector<16x128xf32>
    %87 = math.log %86 : vector<16x128xf32>
    %cst_34 = arith.constant 1.000000e+00 : f32
    %88 = vector.broadcast %cst_34 : f32 to vector<16x128xf32>
    %cst_35 = arith.constant 7.000000e+00 : f32
    %89 = vector.broadcast %cst_35 : f32 to vector<16x128xf32>
    %90 = arith.cmpf olt, %86, %89 : vector<16x128xf32>
    %91 = arith.mulf %88, %86 : vector<16x128xf32>
    %92 = arith.select %90, %91, %88 : vector<16x128xi1>, vector<16x128xf32>
    %cst_36 = arith.constant 1.000000e+00 : f32
    %93 = vector.broadcast %cst_36 : f32 to vector<16x128xf32>
    %94 = arith.addf %86, %93 : vector<16x128xf32>
    %95 = arith.select %90, %94, %86 : vector<16x128xi1>, vector<16x128xf32>
    %cst_37 = arith.constant 7.000000e+00 : f32
    %96 = vector.broadcast %cst_37 : f32 to vector<16x128xf32>
    %97 = arith.cmpf olt, %95, %96 : vector<16x128xf32>
    %98 = arith.mulf %92, %95 : vector<16x128xf32>
    %99 = arith.select %97, %98, %92 : vector<16x128xi1>, vector<16x128xf32>
    %cst_38 = arith.constant 1.000000e+00 : f32
    %100 = vector.broadcast %cst_38 : f32 to vector<16x128xf32>
    %101 = arith.addf %95, %100 : vector<16x128xf32>
    %102 = arith.select %97, %101, %95 : vector<16x128xi1>, vector<16x128xf32>
    %cst_39 = arith.constant 7.000000e+00 : f32
    %103 = vector.broadcast %cst_39 : f32 to vector<16x128xf32>
    %104 = arith.cmpf olt, %102, %103 : vector<16x128xf32>
    %105 = arith.mulf %99, %102 : vector<16x128xf32>
    %106 = arith.select %104, %105, %99 : vector<16x128xi1>, vector<16x128xf32>
    %cst_40 = arith.constant 1.000000e+00 : f32
    %107 = vector.broadcast %cst_40 : f32 to vector<16x128xf32>
    %108 = arith.addf %102, %107 : vector<16x128xf32>
    %109 = arith.select %104, %108, %102 : vector<16x128xi1>, vector<16x128xf32>
    %cst_41 = arith.constant 7.000000e+00 : f32
    %110 = vector.broadcast %cst_41 : f32 to vector<16x128xf32>
    %111 = arith.cmpf olt, %109, %110 : vector<16x128xf32>
    %112 = arith.mulf %106, %109 : vector<16x128xf32>
    %113 = arith.select %111, %112, %106 : vector<16x128xi1>, vector<16x128xf32>
    %cst_42 = arith.constant 1.000000e+00 : f32
    %114 = vector.broadcast %cst_42 : f32 to vector<16x128xf32>
    %115 = arith.addf %109, %114 : vector<16x128xf32>
    %116 = arith.select %111, %115, %109 : vector<16x128xi1>, vector<16x128xf32>
    %cst_43 = arith.constant 7.000000e+00 : f32
    %117 = vector.broadcast %cst_43 : f32 to vector<16x128xf32>
    %118 = arith.cmpf olt, %116, %117 : vector<16x128xf32>
    %119 = arith.mulf %113, %116 : vector<16x128xf32>
    %120 = arith.select %118, %119, %113 : vector<16x128xi1>, vector<16x128xf32>
    %cst_44 = arith.constant 1.000000e+00 : f32
    %121 = vector.broadcast %cst_44 : f32 to vector<16x128xf32>
    %122 = arith.addf %116, %121 : vector<16x128xf32>
    %123 = arith.select %118, %122, %116 : vector<16x128xi1>, vector<16x128xf32>
    %cst_45 = arith.constant 7.000000e+00 : f32
    %124 = vector.broadcast %cst_45 : f32 to vector<16x128xf32>
    %125 = arith.cmpf olt, %123, %124 : vector<16x128xf32>
    %126 = arith.mulf %120, %123 : vector<16x128xf32>
    %127 = arith.select %125, %126, %120 : vector<16x128xi1>, vector<16x128xf32>
    %cst_46 = arith.constant 1.000000e+00 : f32
    %128 = vector.broadcast %cst_46 : f32 to vector<16x128xf32>
    %129 = arith.addf %123, %128 : vector<16x128xf32>
    %130 = arith.select %125, %129, %123 : vector<16x128xi1>, vector<16x128xf32>
    %cst_47 = arith.constant 7.000000e+00 : f32
    %131 = vector.broadcast %cst_47 : f32 to vector<16x128xf32>
    %132 = arith.cmpf olt, %130, %131 : vector<16x128xf32>
    %133 = arith.mulf %127, %130 : vector<16x128xf32>
    %134 = arith.select %132, %133, %127 : vector<16x128xi1>, vector<16x128xf32>
    %cst_48 = arith.constant 1.000000e+00 : f32
    %135 = vector.broadcast %cst_48 : f32 to vector<16x128xf32>
    %136 = arith.addf %130, %135 : vector<16x128xf32>
    %137 = arith.select %132, %136, %130 : vector<16x128xi1>, vector<16x128xf32>
    %cst_49 = arith.constant 1.000000e+00 : f32
    %138 = vector.broadcast %cst_49 : f32 to vector<16x128xf32>
    %139 = arith.divf %138, %137 : vector<16x128xf32>
    %140 = arith.mulf %139, %139 : vector<16x128xf32>
    %cst_50 = arith.constant 7.93650805E-4 : f32
    %141 = vector.broadcast %cst_50 : f32 to vector<16x128xf32>
    %142 = arith.mulf %140, %141 : vector<16x128xf32>
    %cst_51 = arith.constant -0.00277777785 : f32
    %143 = vector.broadcast %cst_51 : f32 to vector<16x128xf32>
    %144 = arith.addf %143, %142 : vector<16x128xf32>
    %145 = arith.mulf %140, %144 : vector<16x128xf32>
    %cst_52 = arith.constant 0.0833333358 : f32
    %146 = vector.broadcast %cst_52 : f32 to vector<16x128xf32>
    %147 = arith.addf %146, %145 : vector<16x128xf32>
    %148 = arith.mulf %139, %147 : vector<16x128xf32>
    %cst_53 = arith.constant 5.000000e-01 : f32
    %149 = vector.broadcast %cst_53 : f32 to vector<16x128xf32>
    %150 = arith.subf %137, %149 : vector<16x128xf32>
    %151 = math.log %137 : vector<16x128xf32>
    %152 = arith.mulf %150, %151 : vector<16x128xf32>
    %153 = arith.subf %152, %137 : vector<16x128xf32>
    %cst_54 = arith.constant 0.918938517 : f32
    %154 = vector.broadcast %cst_54 : f32 to vector<16x128xf32>
    %155 = arith.addf %153, %154 : vector<16x128xf32>
    %156 = arith.addf %155, %148 : vector<16x128xf32>
    %157 = math.log %134 : vector<16x128xf32>
    %158 = arith.subf %156, %157 : vector<16x128xf32>
    %159 = arith.addf %158, %80 : vector<16x128xf32>
    %160 = arith.addf %7, %86 : vector<16x128xf32>
    %cst_55 = arith.constant 1.000000e+00 : f32
    %161 = vector.broadcast %cst_55 : f32 to vector<16x128xf32>
    %cst_56 = arith.constant 7.000000e+00 : f32
    %162 = vector.broadcast %cst_56 : f32 to vector<16x128xf32>
    %163 = arith.cmpf olt, %160, %162 : vector<16x128xf32>
    %164 = arith.mulf %161, %160 : vector<16x128xf32>
    %165 = arith.select %163, %164, %161 : vector<16x128xi1>, vector<16x128xf32>
    %cst_57 = arith.constant 1.000000e+00 : f32
    %166 = vector.broadcast %cst_57 : f32 to vector<16x128xf32>
    %167 = arith.addf %160, %166 : vector<16x128xf32>
    %168 = arith.select %163, %167, %160 : vector<16x128xi1>, vector<16x128xf32>
    %cst_58 = arith.constant 7.000000e+00 : f32
    %169 = vector.broadcast %cst_58 : f32 to vector<16x128xf32>
    %170 = arith.cmpf olt, %168, %169 : vector<16x128xf32>
    %171 = arith.mulf %165, %168 : vector<16x128xf32>
    %172 = arith.select %170, %171, %165 : vector<16x128xi1>, vector<16x128xf32>
    %cst_59 = arith.constant 1.000000e+00 : f32
    %173 = vector.broadcast %cst_59 : f32 to vector<16x128xf32>
    %174 = arith.addf %168, %173 : vector<16x128xf32>
    %175 = arith.select %170, %174, %168 : vector<16x128xi1>, vector<16x128xf32>
    %cst_60 = arith.constant 7.000000e+00 : f32
    %176 = vector.broadcast %cst_60 : f32 to vector<16x128xf32>
    %177 = arith.cmpf olt, %175, %176 : vector<16x128xf32>
    %178 = arith.mulf %172, %175 : vector<16x128xf32>
    %179 = arith.select %177, %178, %172 : vector<16x128xi1>, vector<16x128xf32>
    %cst_61 = arith.constant 1.000000e+00 : f32
    %180 = vector.broadcast %cst_61 : f32 to vector<16x128xf32>
    %181 = arith.addf %175, %180 : vector<16x128xf32>
    %182 = arith.select %177, %181, %175 : vector<16x128xi1>, vector<16x128xf32>
    %cst_62 = arith.constant 7.000000e+00 : f32
    %183 = vector.broadcast %cst_62 : f32 to vector<16x128xf32>
    %184 = arith.cmpf olt, %182, %183 : vector<16x128xf32>
    %185 = arith.mulf %179, %182 : vector<16x128xf32>
    %186 = arith.select %184, %185, %179 : vector<16x128xi1>, vector<16x128xf32>
    %cst_63 = arith.constant 1.000000e+00 : f32
    %187 = vector.broadcast %cst_63 : f32 to vector<16x128xf32>
    %188 = arith.addf %182, %187 : vector<16x128xf32>
    %189 = arith.select %184, %188, %182 : vector<16x128xi1>, vector<16x128xf32>
    %cst_64 = arith.constant 7.000000e+00 : f32
    %190 = vector.broadcast %cst_64 : f32 to vector<16x128xf32>
    %191 = arith.cmpf olt, %189, %190 : vector<16x128xf32>
    %192 = arith.mulf %186, %189 : vector<16x128xf32>
    %193 = arith.select %191, %192, %186 : vector<16x128xi1>, vector<16x128xf32>
    %cst_65 = arith.constant 1.000000e+00 : f32
    %194 = vector.broadcast %cst_65 : f32 to vector<16x128xf32>
    %195 = arith.addf %189, %194 : vector<16x128xf32>
    %196 = arith.select %191, %195, %189 : vector<16x128xi1>, vector<16x128xf32>
    %cst_66 = arith.constant 7.000000e+00 : f32
    %197 = vector.broadcast %cst_66 : f32 to vector<16x128xf32>
    %198 = arith.cmpf olt, %196, %197 : vector<16x128xf32>
    %199 = arith.mulf %193, %196 : vector<16x128xf32>
    %200 = arith.select %198, %199, %193 : vector<16x128xi1>, vector<16x128xf32>
    %cst_67 = arith.constant 1.000000e+00 : f32
    %201 = vector.broadcast %cst_67 : f32 to vector<16x128xf32>
    %202 = arith.addf %196, %201 : vector<16x128xf32>
    %203 = arith.select %198, %202, %196 : vector<16x128xi1>, vector<16x128xf32>
    %cst_68 = arith.constant 7.000000e+00 : f32
    %204 = vector.broadcast %cst_68 : f32 to vector<16x128xf32>
    %205 = arith.cmpf olt, %203, %204 : vector<16x128xf32>
    %206 = arith.mulf %200, %203 : vector<16x128xf32>
    %207 = arith.select %205, %206, %200 : vector<16x128xi1>, vector<16x128xf32>
    %cst_69 = arith.constant 1.000000e+00 : f32
    %208 = vector.broadcast %cst_69 : f32 to vector<16x128xf32>
    %209 = arith.addf %203, %208 : vector<16x128xf32>
    %210 = arith.select %205, %209, %203 : vector<16x128xi1>, vector<16x128xf32>
    %cst_70 = arith.constant 1.000000e+00 : f32
    %211 = vector.broadcast %cst_70 : f32 to vector<16x128xf32>
    %212 = arith.divf %211, %210 : vector<16x128xf32>
    %213 = arith.mulf %212, %212 : vector<16x128xf32>
    %cst_71 = arith.constant 7.93650805E-4 : f32
    %214 = vector.broadcast %cst_71 : f32 to vector<16x128xf32>
    %215 = arith.mulf %213, %214 : vector<16x128xf32>
    %cst_72 = arith.constant -0.00277777785 : f32
    %216 = vector.broadcast %cst_72 : f32 to vector<16x128xf32>
    %217 = arith.addf %216, %215 : vector<16x128xf32>
    %218 = arith.mulf %213, %217 : vector<16x128xf32>
    %cst_73 = arith.constant 0.0833333358 : f32
    %219 = vector.broadcast %cst_73 : f32 to vector<16x128xf32>
    %220 = arith.addf %219, %218 : vector<16x128xf32>
    %221 = arith.mulf %212, %220 : vector<16x128xf32>
    %cst_74 = arith.constant 5.000000e-01 : f32
    %222 = vector.broadcast %cst_74 : f32 to vector<16x128xf32>
    %223 = arith.subf %210, %222 : vector<16x128xf32>
    %224 = math.log %210 : vector<16x128xf32>
    %225 = arith.mulf %223, %224 : vector<16x128xf32>
    %226 = arith.subf %225, %210 : vector<16x128xf32>
    %cst_75 = arith.constant 0.918938517 : f32
    %227 = vector.broadcast %cst_75 : f32 to vector<16x128xf32>
    %228 = arith.addf %226, %227 : vector<16x128xf32>
    %229 = arith.addf %228, %221 : vector<16x128xf32>
    %230 = math.log %207 : vector<16x128xf32>
    %231 = arith.subf %229, %230 : vector<16x128xf32>
    %232 = arith.subf %159, %231 : vector<16x128xf32>
    %233 = arith.addf %84, %7 : vector<16x128xf32>
    %234 = arith.addf %86, %82 : vector<16x128xf32>
    %235 = math.log %234 : vector<16x128xf32>
    %236 = arith.subf %235, %87 : vector<16x128xf32>
    %237 = arith.mulf %233, %236 : vector<16x128xf32>
    %cst_76 = arith.constant 1.000000e-10 : f32
    %238 = vector.broadcast %cst_76 : f32 to vector<16x128xf32>
    %239 = arith.addf %82, %238 : vector<16x128xf32>
    %240 = math.log %239 : vector<16x128xf32>
    %241 = arith.subf %87, %240 : vector<16x128xf32>
    %242 = arith.mulf %7, %241 : vector<16x128xf32>
    %243 = arith.addf %237, %242 : vector<16x128xf32>
    %244 = arith.addf %232, %243 : vector<16x128xf32>
    %cst_77 = arith.constant 1.000000e+00 : f32
    %245 = vector.broadcast %cst_77 : f32 to vector<16x128xf32>
    %246 = arith.mulf %3, %245 : vector<16x128xf32>
    %cst_78 = arith.constant 1.000000e+06 : f32
    %247 = vector.broadcast %cst_78 : f32 to vector<16x128xf32>
    %248 = arith.minimumf %4, %247 : vector<16x128xf32>
    %cst_79 = arith.constant 1.000000e-10 : f32
    %249 = vector.broadcast %cst_79 : f32 to vector<16x128xf32>
    %250 = arith.addf %248, %249 : vector<16x128xf32>
    %251 = math.log %250 : vector<16x128xf32>
    %cst_80 = arith.constant 1.000000e+00 : f32
    %252 = vector.broadcast %cst_80 : f32 to vector<16x128xf32>
    %cst_81 = arith.constant 7.000000e+00 : f32
    %253 = vector.broadcast %cst_81 : f32 to vector<16x128xf32>
    %254 = arith.cmpf olt, %250, %253 : vector<16x128xf32>
    %255 = arith.mulf %252, %250 : vector<16x128xf32>
    %256 = arith.select %254, %255, %252 : vector<16x128xi1>, vector<16x128xf32>
    %cst_82 = arith.constant 1.000000e+00 : f32
    %257 = vector.broadcast %cst_82 : f32 to vector<16x128xf32>
    %258 = arith.addf %250, %257 : vector<16x128xf32>
    %259 = arith.select %254, %258, %250 : vector<16x128xi1>, vector<16x128xf32>
    %cst_83 = arith.constant 7.000000e+00 : f32
    %260 = vector.broadcast %cst_83 : f32 to vector<16x128xf32>
    %261 = arith.cmpf olt, %259, %260 : vector<16x128xf32>
    %262 = arith.mulf %256, %259 : vector<16x128xf32>
    %263 = arith.select %261, %262, %256 : vector<16x128xi1>, vector<16x128xf32>
    %cst_84 = arith.constant 1.000000e+00 : f32
    %264 = vector.broadcast %cst_84 : f32 to vector<16x128xf32>
    %265 = arith.addf %259, %264 : vector<16x128xf32>
    %266 = arith.select %261, %265, %259 : vector<16x128xi1>, vector<16x128xf32>
    %cst_85 = arith.constant 7.000000e+00 : f32
    %267 = vector.broadcast %cst_85 : f32 to vector<16x128xf32>
    %268 = arith.cmpf olt, %266, %267 : vector<16x128xf32>
    %269 = arith.mulf %263, %266 : vector<16x128xf32>
    %270 = arith.select %268, %269, %263 : vector<16x128xi1>, vector<16x128xf32>
    %cst_86 = arith.constant 1.000000e+00 : f32
    %271 = vector.broadcast %cst_86 : f32 to vector<16x128xf32>
    %272 = arith.addf %266, %271 : vector<16x128xf32>
    %273 = arith.select %268, %272, %266 : vector<16x128xi1>, vector<16x128xf32>
    %cst_87 = arith.constant 7.000000e+00 : f32
    %274 = vector.broadcast %cst_87 : f32 to vector<16x128xf32>
    %275 = arith.cmpf olt, %273, %274 : vector<16x128xf32>
    %276 = arith.mulf %270, %273 : vector<16x128xf32>
    %277 = arith.select %275, %276, %270 : vector<16x128xi1>, vector<16x128xf32>
    %cst_88 = arith.constant 1.000000e+00 : f32
    %278 = vector.broadcast %cst_88 : f32 to vector<16x128xf32>
    %279 = arith.addf %273, %278 : vector<16x128xf32>
    %280 = arith.select %275, %279, %273 : vector<16x128xi1>, vector<16x128xf32>
    %cst_89 = arith.constant 7.000000e+00 : f32
    %281 = vector.broadcast %cst_89 : f32 to vector<16x128xf32>
    %282 = arith.cmpf olt, %280, %281 : vector<16x128xf32>
    %283 = arith.mulf %277, %280 : vector<16x128xf32>
    %284 = arith.select %282, %283, %277 : vector<16x128xi1>, vector<16x128xf32>
    %cst_90 = arith.constant 1.000000e+00 : f32
    %285 = vector.broadcast %cst_90 : f32 to vector<16x128xf32>
    %286 = arith.addf %280, %285 : vector<16x128xf32>
    %287 = arith.select %282, %286, %280 : vector<16x128xi1>, vector<16x128xf32>
    %cst_91 = arith.constant 7.000000e+00 : f32
    %288 = vector.broadcast %cst_91 : f32 to vector<16x128xf32>
    %289 = arith.cmpf olt, %287, %288 : vector<16x128xf32>
    %290 = arith.mulf %284, %287 : vector<16x128xf32>
    %291 = arith.select %289, %290, %284 : vector<16x128xi1>, vector<16x128xf32>
    %cst_92 = arith.constant 1.000000e+00 : f32
    %292 = vector.broadcast %cst_92 : f32 to vector<16x128xf32>
    %293 = arith.addf %287, %292 : vector<16x128xf32>
    %294 = arith.select %289, %293, %287 : vector<16x128xi1>, vector<16x128xf32>
    %cst_93 = arith.constant 7.000000e+00 : f32
    %295 = vector.broadcast %cst_93 : f32 to vector<16x128xf32>
    %296 = arith.cmpf olt, %294, %295 : vector<16x128xf32>
    %297 = arith.mulf %291, %294 : vector<16x128xf32>
    %298 = arith.select %296, %297, %291 : vector<16x128xi1>, vector<16x128xf32>
    %cst_94 = arith.constant 1.000000e+00 : f32
    %299 = vector.broadcast %cst_94 : f32 to vector<16x128xf32>
    %300 = arith.addf %294, %299 : vector<16x128xf32>
    %301 = arith.select %296, %300, %294 : vector<16x128xi1>, vector<16x128xf32>
    %cst_95 = arith.constant 1.000000e+00 : f32
    %302 = vector.broadcast %cst_95 : f32 to vector<16x128xf32>
    %303 = arith.divf %302, %301 : vector<16x128xf32>
    %304 = arith.mulf %303, %303 : vector<16x128xf32>
    %cst_96 = arith.constant 7.93650805E-4 : f32
    %305 = vector.broadcast %cst_96 : f32 to vector<16x128xf32>
    %306 = arith.mulf %304, %305 : vector<16x128xf32>
    %cst_97 = arith.constant -0.00277777785 : f32
    %307 = vector.broadcast %cst_97 : f32 to vector<16x128xf32>
    %308 = arith.addf %307, %306 : vector<16x128xf32>
    %309 = arith.mulf %304, %308 : vector<16x128xf32>
    %cst_98 = arith.constant 0.0833333358 : f32
    %310 = vector.broadcast %cst_98 : f32 to vector<16x128xf32>
    %311 = arith.addf %310, %309 : vector<16x128xf32>
    %312 = arith.mulf %303, %311 : vector<16x128xf32>
    %cst_99 = arith.constant 5.000000e-01 : f32
    %313 = vector.broadcast %cst_99 : f32 to vector<16x128xf32>
    %314 = arith.subf %301, %313 : vector<16x128xf32>
    %315 = math.log %301 : vector<16x128xf32>
    %316 = arith.mulf %314, %315 : vector<16x128xf32>
    %317 = arith.subf %316, %301 : vector<16x128xf32>
    %cst_100 = arith.constant 0.918938517 : f32
    %318 = vector.broadcast %cst_100 : f32 to vector<16x128xf32>
    %319 = arith.addf %317, %318 : vector<16x128xf32>
    %320 = arith.addf %319, %312 : vector<16x128xf32>
    %321 = math.log %298 : vector<16x128xf32>
    %322 = arith.subf %320, %321 : vector<16x128xf32>
    %323 = arith.addf %322, %80 : vector<16x128xf32>
    %324 = arith.addf %7, %250 : vector<16x128xf32>
    %cst_101 = arith.constant 1.000000e+00 : f32
    %325 = vector.broadcast %cst_101 : f32 to vector<16x128xf32>
    %cst_102 = arith.constant 7.000000e+00 : f32
    %326 = vector.broadcast %cst_102 : f32 to vector<16x128xf32>
    %327 = arith.cmpf olt, %324, %326 : vector<16x128xf32>
    %328 = arith.mulf %325, %324 : vector<16x128xf32>
    %329 = arith.select %327, %328, %325 : vector<16x128xi1>, vector<16x128xf32>
    %cst_103 = arith.constant 1.000000e+00 : f32
    %330 = vector.broadcast %cst_103 : f32 to vector<16x128xf32>
    %331 = arith.addf %324, %330 : vector<16x128xf32>
    %332 = arith.select %327, %331, %324 : vector<16x128xi1>, vector<16x128xf32>
    %cst_104 = arith.constant 7.000000e+00 : f32
    %333 = vector.broadcast %cst_104 : f32 to vector<16x128xf32>
    %334 = arith.cmpf olt, %332, %333 : vector<16x128xf32>
    %335 = arith.mulf %329, %332 : vector<16x128xf32>
    %336 = arith.select %334, %335, %329 : vector<16x128xi1>, vector<16x128xf32>
    %cst_105 = arith.constant 1.000000e+00 : f32
    %337 = vector.broadcast %cst_105 : f32 to vector<16x128xf32>
    %338 = arith.addf %332, %337 : vector<16x128xf32>
    %339 = arith.select %334, %338, %332 : vector<16x128xi1>, vector<16x128xf32>
    %cst_106 = arith.constant 7.000000e+00 : f32
    %340 = vector.broadcast %cst_106 : f32 to vector<16x128xf32>
    %341 = arith.cmpf olt, %339, %340 : vector<16x128xf32>
    %342 = arith.mulf %336, %339 : vector<16x128xf32>
    %343 = arith.select %341, %342, %336 : vector<16x128xi1>, vector<16x128xf32>
    %cst_107 = arith.constant 1.000000e+00 : f32
    %344 = vector.broadcast %cst_107 : f32 to vector<16x128xf32>
    %345 = arith.addf %339, %344 : vector<16x128xf32>
    %346 = arith.select %341, %345, %339 : vector<16x128xi1>, vector<16x128xf32>
    %cst_108 = arith.constant 7.000000e+00 : f32
    %347 = vector.broadcast %cst_108 : f32 to vector<16x128xf32>
    %348 = arith.cmpf olt, %346, %347 : vector<16x128xf32>
    %349 = arith.mulf %343, %346 : vector<16x128xf32>
    %350 = arith.select %348, %349, %343 : vector<16x128xi1>, vector<16x128xf32>
    %cst_109 = arith.constant 1.000000e+00 : f32
    %351 = vector.broadcast %cst_109 : f32 to vector<16x128xf32>
    %352 = arith.addf %346, %351 : vector<16x128xf32>
    %353 = arith.select %348, %352, %346 : vector<16x128xi1>, vector<16x128xf32>
    %cst_110 = arith.constant 7.000000e+00 : f32
    %354 = vector.broadcast %cst_110 : f32 to vector<16x128xf32>
    %355 = arith.cmpf olt, %353, %354 : vector<16x128xf32>
    %356 = arith.mulf %350, %353 : vector<16x128xf32>
    %357 = arith.select %355, %356, %350 : vector<16x128xi1>, vector<16x128xf32>
    %cst_111 = arith.constant 1.000000e+00 : f32
    %358 = vector.broadcast %cst_111 : f32 to vector<16x128xf32>
    %359 = arith.addf %353, %358 : vector<16x128xf32>
    %360 = arith.select %355, %359, %353 : vector<16x128xi1>, vector<16x128xf32>
    %cst_112 = arith.constant 7.000000e+00 : f32
    %361 = vector.broadcast %cst_112 : f32 to vector<16x128xf32>
    %362 = arith.cmpf olt, %360, %361 : vector<16x128xf32>
    %363 = arith.mulf %357, %360 : vector<16x128xf32>
    %364 = arith.select %362, %363, %357 : vector<16x128xi1>, vector<16x128xf32>
    %cst_113 = arith.constant 1.000000e+00 : f32
    %365 = vector.broadcast %cst_113 : f32 to vector<16x128xf32>
    %366 = arith.addf %360, %365 : vector<16x128xf32>
    %367 = arith.select %362, %366, %360 : vector<16x128xi1>, vector<16x128xf32>
    %cst_114 = arith.constant 7.000000e+00 : f32
    %368 = vector.broadcast %cst_114 : f32 to vector<16x128xf32>
    %369 = arith.cmpf olt, %367, %368 : vector<16x128xf32>
    %370 = arith.mulf %364, %367 : vector<16x128xf32>
    %371 = arith.select %369, %370, %364 : vector<16x128xi1>, vector<16x128xf32>
    %cst_115 = arith.constant 1.000000e+00 : f32
    %372 = vector.broadcast %cst_115 : f32 to vector<16x128xf32>
    %373 = arith.addf %367, %372 : vector<16x128xf32>
    %374 = arith.select %369, %373, %367 : vector<16x128xi1>, vector<16x128xf32>
    %cst_116 = arith.constant 1.000000e+00 : f32
    %375 = vector.broadcast %cst_116 : f32 to vector<16x128xf32>
    %376 = arith.divf %375, %374 : vector<16x128xf32>
    %377 = arith.mulf %376, %376 : vector<16x128xf32>
    %cst_117 = arith.constant 7.93650805E-4 : f32
    %378 = vector.broadcast %cst_117 : f32 to vector<16x128xf32>
    %379 = arith.mulf %377, %378 : vector<16x128xf32>
    %cst_118 = arith.constant -0.00277777785 : f32
    %380 = vector.broadcast %cst_118 : f32 to vector<16x128xf32>
    %381 = arith.addf %380, %379 : vector<16x128xf32>
    %382 = arith.mulf %377, %381 : vector<16x128xf32>
    %cst_119 = arith.constant 0.0833333358 : f32
    %383 = vector.broadcast %cst_119 : f32 to vector<16x128xf32>
    %384 = arith.addf %383, %382 : vector<16x128xf32>
    %385 = arith.mulf %376, %384 : vector<16x128xf32>
    %cst_120 = arith.constant 5.000000e-01 : f32
    %386 = vector.broadcast %cst_120 : f32 to vector<16x128xf32>
    %387 = arith.subf %374, %386 : vector<16x128xf32>
    %388 = math.log %374 : vector<16x128xf32>
    %389 = arith.mulf %387, %388 : vector<16x128xf32>
    %390 = arith.subf %389, %374 : vector<16x128xf32>
    %cst_121 = arith.constant 0.918938517 : f32
    %391 = vector.broadcast %cst_121 : f32 to vector<16x128xf32>
    %392 = arith.addf %390, %391 : vector<16x128xf32>
    %393 = arith.addf %392, %385 : vector<16x128xf32>
    %394 = math.log %371 : vector<16x128xf32>
    %395 = arith.subf %393, %394 : vector<16x128xf32>
    %396 = arith.subf %323, %395 : vector<16x128xf32>
    %397 = arith.addf %248, %7 : vector<16x128xf32>
    %398 = arith.addf %250, %246 : vector<16x128xf32>
    %399 = math.log %398 : vector<16x128xf32>
    %400 = arith.subf %399, %251 : vector<16x128xf32>
    %401 = arith.mulf %397, %400 : vector<16x128xf32>
    %cst_122 = arith.constant 1.000000e-10 : f32
    %402 = vector.broadcast %cst_122 : f32 to vector<16x128xf32>
    %403 = arith.addf %246, %402 : vector<16x128xf32>
    %404 = math.log %403 : vector<16x128xf32>
    %405 = arith.subf %251, %404 : vector<16x128xf32>
    %406 = arith.mulf %7, %405 : vector<16x128xf32>
    %407 = arith.addf %401, %406 : vector<16x128xf32>
    %408 = arith.addf %396, %407 : vector<16x128xf32>
    %409 = arith.addf %408, %244 : vector<16x128xf32>
    %c0_123 = arith.constant 0 : index
    %c0_124 = arith.constant 0 : index
    %410 = vector.load %arg8[%c0_123, %c0_124] : memref<16x128xf32, #tpu.memory_space<vmem>>, vector<16x128xf32>
    %411 = arith.addf %410, %409 : vector<16x128xf32>
    %c0_125 = arith.constant 0 : index
    %c0_126 = arith.constant 0 : index
    %412 = vector.load %arg8[%c0_125, %c0_126] : memref<16x128xf32, #tpu.memory_space<vmem>>, vector<16x128xf32>
    tpu.vector_store %arg8[%c0_125, %c0_126], %411 {strides = array<i32>} : memref<16x128xf32, #tpu.memory_space<vmem>>, vector<16x128xf32>,
    %c0_i32_127 = arith.constant 0 : i32
    %413 = arith.cmpi eq, %arg1, %c0_i32_127 : i32
    %414 = arith.extui %413 : i1 to i32
    %c0_i32_128 = arith.constant 0 : i32
    %415 = arith.cmpi ne, %414, %c0_i32_128 : i32
    scf.if %415 {
      %c0_129 = arith.constant 0 : index
      %c0_130 = arith.constant 0 : index
      %416 = vector.load %arg8[%c0_129, %c0_130] : memref<16x128xf32, #tpu.memory_space<vmem>>, vector<16x128xf32>
      %417 = vector.shape_cast %416 : vector<16x128xf32> to vector<1x16x128xf32>
      %cst_131 = arith.constant dense<0.000000e+00> : vector<1xf32>
      %418 = vector.multi_reduction <add>, %417, %cst_131 [1, 2] : vector<1x16x128xf32> to vector<1xf32>
      %419 = vector.shape_cast %418 : vector<1xf32> to vector<1x1x1xf32>
      %420 = vector.extract %419[0, 0, 0] : f32 from vector<1x1x1xf32>
      %421 = vector.broadcast %420 : f32 to vector<1x8x128xf32>
      %c0_132 = arith.constant 0 : index
      %c0_133 = arith.constant 0 : index
      %c0_134 = arith.constant 0 : index
      %422 = vector.load %arg7[%c0_132, %c0_133, %c0_134] : memref<1x8x128xf32, #tpu.memory_space<vmem>>, vector<1x8x128xf32>
      tpu.vector_store %arg7[%c0_132, %c0_133, %c0_134], %421 {strides = array<i32>} : memref<1x8x128xf32, #tpu.memory_space<vmem>>, vector<1x8x128xf32>,
    } else {
    }
    return
  }
  func.func @transform_0(%arg0: i32, %arg1: i32) -> (i32, i32) {
    %c1_i32 = arith.constant 1 : i32
    %0 = arith.muli %arg0, %c1_i32 : i32
    %1 = arith.addi %0, %arg1 : i32
    %c0_i32 = arith.constant 0 : i32
    %c0_i32_0 = arith.constant 0 : i32
    return %1, %c0_i32 : i32, i32
  }
  func.func @transform_1(%arg0: i32, %arg1: i32) -> (i32, i32) {
    %c1_i32 = arith.constant 1 : i32
    %0 = arith.muli %arg0, %c1_i32 : i32
    %1 = arith.addi %0, %arg1 : i32
    %c0_i32 = arith.constant 0 : i32
    %c0_i32_0 = arith.constant 0 : i32
    return %1, %c0_i32 : i32, i32
  }
  func.func @transform_2(%arg0: i32, %arg1: i32) -> (i32, i32) {
    %c1_i32 = arith.constant 1 : i32
    %0 = arith.muli %arg0, %c1_i32 : i32
    %1 = arith.addi %0, %arg1 : i32
    %c0_i32 = arith.constant 0 : i32
    %c0_i32_0 = arith.constant 0 : i32
    return %1, %c0_i32 : i32, i32
  }
  func.func @transform_3(%arg0: i32, %arg1: i32) -> (i32, i32) {
    %c1_i32 = arith.constant 1 : i32
    %0 = arith.muli %arg0, %c1_i32 : i32
    %1 = arith.addi %0, %arg1 : i32
    %c0_i32 = arith.constant 0 : i32
    %c0_i32_0 = arith.constant 0 : i32
    return %1, %c0_i32 : i32, i32
  }
  func.func @transform_4(%arg0: i32, %arg1: i32) -> (i32, i32) {
    %c1_i32 = arith.constant 1 : i32
    %0 = arith.muli %arg0, %c1_i32 : i32
    %1 = arith.addi %0, %arg1 : i32
    %c0_i32 = arith.constant 0 : i32
    %c0_i32_0 = arith.constant 0 : i32
    return %1, %c0_i32 : i32, i32
  }
  func.func @transform_5(%arg0: i32, %arg1: i32) -> (i32, i32, i32) {
    %c0_i32 = arith.constant 0 : i32
    %c0_i32_0 = arith.constant 0 : i32
    %c0_i32_1 = arith.constant 0 : i32
    return %arg0, %c0_i32, %c0_i32_0 : i32, i32, i32
  }
}

</mosaic_0001>

<bundles_post_ra>
// kernel: tpu_custom_call.1
= control target key start
LH: loop header
LB: loop body
LE: loop exit
PB: predicated region body
PF: predicated region fallthrough
CT: control target
= control target key end

     0   :  { %10 = vsyncpa [#allocation4], 0  ;;  %s1605_s0 = inlined_call_operand.hbm [shape: f32[16,128], index: 0, kind: input, shape index: {}]   ;;  %s1606_s1 = inlined_call_operand.hbm [shape: f32[16,128], index: 1, kind: input, shape index: {}]   ;;  %s1607_s2 = inlined_call_operand.hbm [shape: f32[16,128], index: 2, kind: input, shape index: {}]   ;;  %s1608_s3 = inlined_call_operand.hbm [shape: f32[16,128], index: 3, kind: input, shape index: {}]   ;;  %s1609_s4 = inlined_call_operand.hbm [shape: f32[16,128], index: 4, kind: input, shape index: {}]   ;;  %s1610_s5 = inlined_call_operand.hbm [shape: f32[1,8,128], index: 5, kind: output, shape index: {}]  }
   0x1   :  { %11 = vsyncpa [#allocation7], 0 }
   0x2   :  { %12 = vsyncpa [#allocation10], 0 }
   0x3   :  { %13 = vsyncpa [#allocation5], 0  ;;  %s1013_s18 = smov [#allocation6]   ;;  %s1014_s20 = smov [#allocation9]  }
   0x4   :  { %s39_s19 = sshll.u32 %s1013_s18, 4  ;;  %s71_s21 = sshll.u32 %s1014_s20, 4  ;;  %s40_s19 = int_to_ptr.vmem [resolvable:$true] %s39_s19  ;;  %s72_s21 = int_to_ptr.vmem [resolvable:$true] %s71_s21 }
   0x5   :  { %s893_s22 = scalar_lea.vmem %s40_s19, 256  ;;  %p898_p1 = scmp.lt.s32.totalorder %s40_s19, %s40_s19 }
   0x6   :  { %p894_p0 = scmp.ne.s32.totalorder %s40_s19, %s893_s22  ;;  %p899_p2 = scmp.lt.s32.totalorder %s893_s22, %s893_s22 }
   0x8   :  { %p900_p3 = por %p899_p2, %p898_p1 }
   0xa   :  { %p901_p4 = pnand %p900_p3, %p894_p0 }
   0xc   :  { %904 = shalt.err (!%p901_p4)
}
   0xd   :  { %s1015_s23 = smov 128   ;;  %s1016_s24 = smov 8  }
   0xe   :  { %45 = dma.hbm_to_vmem [thread:$0]  %s1606_s1, 256, %s40_s19, [#allocation7], %s1015_s23, %s1015_s23, %s1016_s24  }
   0xf   :  { %s913_s27 = scalar_lea.vmem %s72_s21, 256  ;;  %p918_p6 = scmp.lt.s32.totalorder %s72_s21, %s72_s21 }
  0x10   :  { %p914_p5 = scmp.ne.s32.totalorder %s72_s21, %s913_s27  ;;  %p919_p7 = scmp.lt.s32.totalorder %s913_s27, %s913_s27 }
  0x12   :  { %p920_p8 = por %p919_p7, %p918_p6 }
  0x14   :  { %p921_p9 = pnand %p920_p8, %p914_p5 }
  0x16   :  { %924 = shalt.err (!%p921_p9)
}
  0x17   :  { %77 = dma.hbm_to_vmem [thread:$0]  %s1608_s3, 256, %s72_s21, [#allocation10], %s1015_s23, %s1015_s23, %s1016_s24  }
  0x18   :  { %s1017_s30 = smov [#allocation3]   ;;  %s1018_s7 = smov [#allocation8]  }
  0x19   :  { %s23_s6 = sshll.u32 %s1017_s30, 4  ;;  %s55_s8 = sshll.u32 %s1018_s7, 4  ;;  %s24_s6 = int_to_ptr.vmem [resolvable:$true] %s23_s6  ;;  %s56_s8 = int_to_ptr.vmem [resolvable:$true] %s55_s8 }
  0x1a   :  { %s933_s1 = scalar_lea.vmem %s24_s6, 256  ;;  %p938_p11 = scmp.lt.s32.totalorder %s24_s6, %s24_s6 }
  0x1b   :  { %p934_p10 = scmp.ne.s32.totalorder %s24_s6, %s933_s1  ;;  %p939_p12 = scmp.lt.s32.totalorder %s933_s1, %s933_s1 }
  0x1d   :  { %p940_p13 = por %p939_p12, %p938_p11 }
  0x1f   :  { %p941_p0 = pnand %p940_p13, %p934_p10 }
  0x21   :  { %944 = shalt.err (!%p941_p0)
}
  0x22   :  { %29 = dma.hbm_to_vmem [thread:$0]  %s1605_s0, 256, %s24_s6, [#allocation4], %s1015_s23, %s1015_s23, %s1016_s24  }
  0x23   :  { %s953_s3 = scalar_lea.vmem %s56_s8, 256  ;;  %p958_p2 = scmp.lt.s32.totalorder %s56_s8, %s56_s8 }
  0x24   :  { %p954_p1 = scmp.ne.s32.totalorder %s56_s8, %s953_s3  ;;  %p959_p3 = scmp.lt.s32.totalorder %s953_s3, %s953_s3 }
  0x26   :  { %p960_p4 = por %p959_p3, %p958_p2 }
  0x28   :  { %p961_p5 = pnand %p960_p4, %p954_p1 }
  0x2a   :  { %964 = shalt.err (!%p961_p5)
}
  0x2b   :  { %61 = dma.hbm_to_vmem [thread:$0]  %s1607_s2, 256, %s56_s8, [#allocation7], %s1015_s23, %s1015_s23, %s1016_s24  }
  0x2c   :  { %s1019_s13 = smov [#allocation11]  }
  0x2d   :  { %s87_s14 = sshll.u32 %s1019_s13, 4  ;;  %s88_s14 = int_to_ptr.vmem [resolvable:$true] %s87_s14 }
  0x2e   :  { %s973_s15 = scalar_lea.vmem %s88_s14, 256  ;;  %p978_p7 = scmp.lt.s32.totalorder %s88_s14, %s88_s14 }
  0x2f   :  { %p974_p6 = scmp.ne.s32.totalorder %s88_s14, %s973_s15  ;;  %p979_p8 = scmp.lt.s32.totalorder %s973_s15, %s973_s15 }
  0x31   :  { %p980_p9 = por %p979_p8, %p978_p7 }
  0x33   :  { %p981_p10 = pnand %p980_p9, %p974_p6 }
  0x35   :  { %984 = shalt.err (!%p981_p10)
}
  0x36   :  { %93 = dma.hbm_to_vmem [thread:$0]  %s1609_s4, 256, %s88_s14, [#allocation10], %s1015_s23, %s1015_s23, %s1016_s24  }
  0x37   :  { %1005 = dma.done.wait [#allocation4], 256  }
  0x38   :  { %1006 = vsyncadd [#allocation4], 4294967040 }
  0x39   :  { %1007 = dma.done.wait [#allocation7], 512  }
  0x3a   :  { %1008 = vsyncadd [#allocation7], 4294966784 }
  0x3b   :  { %1009 = dma.done.wait [#allocation10], 512  }
  0x3c   :  { %1010 = vsyncadd [#allocation10], 4294966784  ;;  %v1081_v0 = vld [vmem:[#allocation11] sm:$0xff]  ;;  %v1083_v1 = vld [vmem:[#allocation9] sm:$0xff]  ;;  %s1020_s2 = smov [#allocation12]  }
  0x3d   :  { %v1085_v2 = vld [vmem:[#allocation9 + $0x8] sm:$0xff]  ;;  %v1087_v3 = vld [vmem:[#allocation11 + $0x8] sm:$0xff]  ;;  %v135_v4 = vadd.f32 1.0, %v1081_v0  ;;  %v241_v8 = vmin.f32 %v1083_v1, 1000000.0  ;;  %s768_s4 = sshll.u32 %s1020_s2, 4  ;;  %s769_s4 = int_to_ptr.vmem [resolvable:$true] %s768_s4 }
  0x3e   :  { %v136_v5 = vadd.f32 1.0, %v1087_v3  ;;  %v242_v9 = vmin.f32 %v1085_v2, 1000000.0  ;;  %s985_s18 = scalar_lea.vmem %s769_s4, 128  ;;  %p990_p12 = scmp.lt.s32.totalorder %s769_s4, %s769_s4 }
  0x3f   :  { %vm137_vm0 = vcmp.lt.f32.partialorder %v135_v4, 7.0  ;;  %v141_v6 = vadd.f32 1.0, %v135_v4  ;;  %v1096_v17 = vadd.f32 1e-10, %v241_v8  ;;  %p986_p11 = scmp.ne.s32.totalorder %s769_s4, %s985_s18  ;;  %p991_p13 = scmp.lt.s32.totalorder %s985_s18, %s985_s18 }
  0x40   :  { %vm138_vm1 = vcmp.lt.f32.partialorder %v136_v5, 7.0  ;;  %v142_v7 = vadd.f32 1.0, %v136_v5  ;;  %v139_v13 = vsel %vm137_vm0, %v135_v4, 1.0  ;;  %v1100_v18 = vadd.f32 1e-10, %v242_v9 }
  0x41   :  { %v143_v10 = vsel %vm137_vm0, %v141_v6, %v135_v4  ;;  %v140_v15 = vsel %vm138_vm1, %v136_v5, 1.0  ;;  %v253_v26 = vadd.f32 1.0, %v1096_v17  ;;  %vm249_vm8 = vcmp.lt.f32.partialorder %v1096_v17, 7.0  ;;  %p992_p0 = por %p991_p13, %p990_p12 }
  0x42   :  { %v144_v11 = vsel %vm138_vm1, %v142_v7, %v136_v5  ;;  %vm145_vm2 = vcmp.lt.f32.partialorder %v143_v10, 7.0  ;;  %v151_v12 = vadd.f32 1.0, %v143_v10  ;;  %v147_v20 = vmul.f32 %v143_v10, %v139_v13 }
  0x43   :  { %vm146_vm3 = vcmp.lt.f32.partialorder %v144_v11, 7.0  ;;  %v152_v14 = vadd.f32 1.0, %v144_v11  ;;  %v148_v23 = vmul.f32 %v144_v11, %v140_v15  ;;  %v254_v27 = vadd.f32 1.0, %v1100_v18  ;;  %p993_p1 = pnand %p992_p0, %p986_p11 }
  0x44   :  { %v153_v16 = vsel %vm145_vm2, %v151_v12, %v143_v10  ;;  %vm250_vm9 = vcmp.lt.f32.partialorder %v1100_v18, 7.0  ;;  %v149_v28 = vsel %vm145_vm2, %v147_v20, %v139_v13  ;;  %v255_v34 = vsel %vm249_vm8, %v253_v26, %v1096_v17 }
  0x45   :  { %v154_v19 = vsel %vm146_vm3, %v152_v14, %v144_v11  ;;  %vm155_vm4 = vcmp.lt.f32.partialorder %v153_v16, 7.0  ;;  %v161_v21 = vadd.f32 1.0, %v153_v16  ;;  %v150_v31 = vsel %vm146_vm3, %v148_v23, %v140_v15 }
  0x46   :  { %vm156_vm5 = vcmp.lt.f32.partialorder %v154_v19, 7.0  ;;  %v162_v22 = vadd.f32 1.0, %v154_v19  ;;  %v256_v35 = vsel %vm250_vm9, %v254_v27, %v1100_v18  ;;  %v157_v36 = vmul.f32 %v153_v16, %v149_v28 }
  0x47   :  { %v163_v24 = vsel %vm155_vm4, %v161_v21, %v153_v16  ;;  %v251_v37 = vsel %vm249_vm8, %v1096_v17, 1.0  ;;  %v158_v38 = vmul.f32 %v154_v19, %v150_v31  ;;  %vm257_vm12 = vcmp.lt.f32.partialorder %v255_v34, 7.0 }
  0x48   :  { %v164_v25 = vsel %vm156_vm5, %v162_v22, %v154_v19  ;;  %vm165_vm6 = vcmp.lt.f32.partialorder %v163_v24, 7.0  ;;  %v171_v29 = vadd.f32 1.0, %v163_v24  ;;  %vm258_vm13 = vcmp.lt.f32.partialorder %v256_v35, 7.0 }
  0x49   :  { %vm166_vm7 = vcmp.lt.f32.partialorder %v164_v25, 7.0  ;;  %v172_v30 = vadd.f32 1.0, %v164_v25  ;;  %v263_v41 = vadd.f32 1.0, %v255_v34  ;;  %v259_v44 = vmul.f32 %v255_v34, %v251_v37 }
  0x4a   :  { %v1112_v32 = vsel %vm165_vm6, %v171_v29, %v163_v24  ;;  %v264_v45 = vadd.f32 1.0, %v256_v35  ;;  %v159_v46 = vsel %vm155_vm4, %v157_v36, %v149_v28  ;;  %v160_v47 = vsel %vm156_vm5, %v158_v38, %v150_v31 }
  0x4b   :  { %v1115_v33 = vsel %vm166_vm7, %v172_v30, %v164_v25  ;;  %vm175_vm10 = vcmp.lt.f32.partialorder %v1112_v32, 7.0  ;;  %v181_v39 = vadd.f32 1.0, %v1112_v32  ;;  %v265_v50 = vsel %vm257_vm12, %v263_v41, %v255_v34 }
  0x4c   :  { %vm176_vm11 = vcmp.lt.f32.partialorder %v1115_v33, 7.0  ;;  %v182_v40 = vadd.f32 1.0, %v1115_v33  ;;  %v266_v51 = vsel %vm258_vm13, %v264_v45, %v256_v35  ;;  %v261_v54 = vsel %vm257_vm12, %v259_v44, %v251_v37 }
  0x4d   :  { %v1129_v42 = vsel %vm175_vm10, %v181_v39, %v1112_v32  ;;  %v167_v55 = vmul.f32 %v163_v24, %v159_v46  ;;  %v168_v56 = vmul.f32 %v164_v25, %v160_v47  ;;  %v252_v57 = vsel %vm250_vm9, %v1100_v18, 1.0 }
  0x4e   :  { %v1134_v43 = vsel %vm176_vm11, %v182_v40, %v1115_v33  ;;  %vm185_vm14 = vcmp.lt.f32.partialorder %v1129_v42, 7.0  ;;  %v191_v48 = vadd.f32 1.0, %v1129_v42  ;;  %vm267_vm0 = vcmp.lt.f32.partialorder %v265_v50, 7.0 }
  0x4f   :  { %vm186_vm15 = vcmp.lt.f32.partialorder %v1134_v43, 7.0  ;;  %v192_v49 = vadd.f32 1.0, %v1134_v43  ;;  %vm268_vm2 = vcmp.lt.f32.partialorder %v266_v51, 7.0  ;;  %v269_v60 = vmul.f32 %v265_v50, %v261_v54 }
  0x50   :  { %v1147_v52 = vsel %vm185_vm14, %v191_v48, %v1129_v42  ;;  %v273_v61 = vadd.f32 1.0, %v265_v50  ;;  %v274_v62 = vadd.f32 1.0, %v266_v51  ;;  %v169_v63 = vsel %vm165_vm6, %v167_v55, %v159_v46 }
  0x51   :  { %v1152_v53 = vsel %vm186_vm15, %v192_v49, %v1134_v43  ;;  %vm195_vm1 = vcmp.lt.f32.partialorder %v1147_v52, 7.0  ;;  %v201_v58 = vadd.f32 1.0, %v1147_v52  ;;  %v170_v4 = vsel %vm166_vm7, %v168_v56, %v160_v47 }
  0x52   :  { %v202_v59 = vadd.f32 1.0, %v1152_v53  ;;  %vm196_vm3 = vcmp.lt.f32.partialorder %v1152_v53, 7.0  ;;  %v275_v6 = vsel %vm267_vm0, %v273_v61, %v265_v50  ;;  %v260_v10 = vmul.f32 %v256_v35, %v252_v57 }
  0x53   :  { %v1167_v5 = vsel %vm195_vm1, %v201_v58, %v1147_v52  ;;  %v276_v11 = vsel %vm268_vm2, %v274_v62, %v266_v51  ;;  %vm277_vm4 = vcmp.lt.f32.partialorder %v275_v6, 7.0  ;;  %v271_v12 = vsel %vm267_vm0, %v269_v60, %v261_v54 }
  0x54   :  { %v1173_v7 = vsel %vm196_vm3, %v202_v59, %v1152_v53  ;;  %vm278_vm5 = vcmp.lt.f32.partialorder %v276_v11, 7.0  ;;  %v283_v13 = vadd.f32 1.0, %v275_v6  ;;  %v177_v14 = vmul.f32 %v1112_v32, %v169_v63 }
  0x55   :  { %799 = vrcp.f32 %v1167_v5  ;;  %v284_v15 = vadd.f32 1.0, %v276_v11  ;;  %v178_v16 = vmul.f32 %v1115_v33, %v170_v4  ;;  %v262_v20 = vsel %vm258_vm13, %v260_v10, %v252_v57 }
  0x56   :  { %801 = vrcp.f32 %v1173_v7  ;;  %v285_v19 = vsel %vm277_vm4, %v283_v13, %v275_v6  ;;  %v279_v21 = vmul.f32 %v275_v6, %v271_v12  ;;  %v179_v23 = vsel %vm175_vm10, %v177_v14, %v169_v63 }
  0x57   :  { %v286_v22 = vsel %vm278_vm5, %v284_v15, %v276_v11  ;;  %v293_v24 = vadd.f32 1.0, %v285_v19  ;;  %v180_v25 = vsel %vm176_vm11, %v178_v16, %v170_v4  ;;  %v270_v26 = vmul.f32 %v266_v51, %v262_v20 }
  0x58   :  { %vm287_vm6 = vcmp.lt.f32.partialorder %v285_v19, 7.0  ;;  %v294_v27 = vadd.f32 1.0, %v286_v22  ;;  %v281_v28 = vsel %vm277_vm4, %v279_v21, %v271_v12  ;;  %vm288_vm7 = vcmp.lt.f32.partialorder %v286_v22, 7.0 }
  0x59   :  { %v187_v29 = vmul.f32 %v1129_v42, %v179_v23  ;;  %803 = vlog2.f32 %v1167_v5  ;;  %v188_v30 = vmul.f32 %v1134_v43, %v180_v25  ;;  %v295_v31 = vsel %vm287_vm6, %v293_v24, %v285_v19 }
  0x5a   :  { %805 = vlog2.f32 %v1173_v7  ;;  %v272_v32 = vsel %vm268_vm2, %v270_v26, %v262_v20  ;;  %v289_v33 = vmul.f32 %v285_v19, %v281_v28  ;;  %v1196_v34 = vsel %vm288_vm7, %v294_v27, %v286_v22 }
  0x5b   :  { %v189_v35 = vsel %vm185_vm14, %v187_v29, %v179_v23  ;;  %v303_v36 = vadd.f32 1.0, %v295_v31  ;;  %v190_v37 = vsel %vm186_vm15, %v188_v30, %v180_v25  ;;  %v280_v38 = vmul.f32 %v276_v11, %v272_v32 }
  0x5c   :  { %vm297_vm8 = vcmp.lt.f32.partialorder %v295_v31, 7.0  ;;  %v304_v39 = vadd.f32 1.0, %v1196_v34  ;;  %v291_v41 = vsel %vm287_vm6, %v289_v33, %v281_v28  ;;  %vm298_vm9 = vcmp.lt.f32.partialorder %v1196_v34, 7.0 }
  0x5d   :  { %v197_v45 = vmul.f32 %v1147_v52, %v189_v35  ;;  %v198_v42 = vmul.f32 %v1152_v53, %v190_v37  ;;  %v305_v46 = vsel %vm297_vm8, %v303_v36, %v295_v31  ;;  %v355_v43 = vadd.f32 %v1096_v17, %v1081_v0 }
  0x5e   :  { %v282_v48 = vsel %vm278_vm5, %v280_v38, %v272_v32  ;;  %v299_v49 = vmul.f32 %v295_v31, %v291_v41  ;;  %v1220_v50 = vsel %vm298_vm9, %v304_v39, %v1196_v34  ;;  %v356_v54 = vadd.f32 %v1100_v18, %v1087_v3  ;;  %v129_v31 = vld [vmem:[#allocation8] sm:$0xff] }
  0x5f   :  { %v199_v55 = vsel %vm195_vm1, %v197_v45, %v189_v35  ;;  %807 = vlog2.f32 %v1096_v17  ;;  %v313_v56 = vadd.f32 1.0, %v305_v46  ;;  %v200_v57 = vsel %vm196_vm3, %v198_v42, %v190_v37  ;;  %v1259_v45 = vld [vmem:[#allocation6] sm:$0xff] }
  0x60   :  { %v290_v58 = vmul.f32 %v286_v22, %v282_v48  ;;  %vm307_vm10 = vcmp.lt.f32.partialorder %v305_v46, 7.0  ;;  %v314_v59 = vadd.f32 1.0, %v1220_v50  ;;  %v301_v62 = vsel %vm297_vm8, %v299_v49, %v291_v41 }
  0x61   :  { %vm308_vm11 = vcmp.lt.f32.partialorder %v1220_v50, 7.0  ;;  %v361_v63 = vadd.f32 1.0, %v355_v43  ;;  %809 = vlog2.f32 %v199_v55  ;;  %vm357_vm12 = vcmp.lt.f32.partialorder %v355_v43, 7.0 }
  0x62   :  { %v1203_v40 = vpop.eup %799  ;;  %v362_v52 = vadd.f32 1.0, %v356_v54  ;;  %v779_v10 = vadd.f32 -0.5, %v1167_v5  ;;  %811 = vlog2.f32 %v200_v57  ;;  %v1236_v53 = vsel %vm307_vm10, %v313_v56, %v305_v46 }
  0x63   :  { %v1207_v44 = vpop.eup %801  ;;  %v209_v47 = vmul.f32 %v1203_v40, %v1203_v40  ;;  %vm358_vm13 = vcmp.lt.f32.partialorder %v356_v54, 7.0  ;;  %v292_v12 = vsel %vm288_vm7, %v290_v58, %v282_v48  ;;  %v309_v13 = vmul.f32 %v305_v46, %v301_v62 }
  0x64   :  { %v210_v51 = vmul.f32 %v1207_v44, %v1207_v44  ;;  %v1242_v14 = vsel %vm308_vm11, %v314_v59, %v1220_v50  ;;  %v780_v16 = vadd.f32 -0.5, %v1173_v7  ;;  %813 = vlog2.f32 %v1100_v18 }
  0x65   :  { %v211_v61 = vmul.f32 0.0007936508, %v209_v47  ;;  %v363_v19 = vsel %vm357_vm12, %v361_v63, %v355_v43  ;;  %815 = vrcp.f32 %v1236_v53  ;;  %v364_v22 = vsel %vm358_vm13, %v362_v52, %v356_v54 }
  0x66   :  { %v804_v60 = vpop.eup %803  ;;  %v212_v4 = vmul.f32 0.0007936508, %v210_v51  ;;  %v300_v23 = vmul.f32 %v1196_v34, %v292_v12  ;;  %817 = vrcp.f32 %v1242_v14  ;;  %v359_v24 = vsel %vm357_vm12, %v355_v43, 1.0 }
  0x67   :  { %v806_v6 = vpop.eup %805  ;;  %v224_v11 = vmul.f32 0.6931472, %v804_v60  ;;  %v213_v15 = vadd.f32 -0.0027777778, %v211_v61  ;;  %v360_v25 = vsel %vm358_vm13, %v356_v54, 1.0  ;;  %v311_v27 = vsel %vm307_vm10, %v309_v13, %v301_v62  ;;  %v130_v54 = vld [vmem:[#allocation8 + $0x8] sm:$0xff] }
  0x68   :  { %v214_v20 = vadd.f32 -0.0027777778, %v212_v4  ;;  %v226_v21 = vmul.f32 0.6931472, %v806_v6  ;;  %vm365_vm14 = vcmp.lt.f32.partialorder %v363_v19, 7.0  ;;  %v371_v28 = vadd.f32 1.0, %v363_v19 }
  0x69   :  { %v227_v26 = vmul.f32 %v779_v10, %v224_v11  ;;  %v215_v29 = vmul.f32 %v213_v15, %v209_v47  ;;  %819 = vlog2.f32 %v1236_v53  ;;  %vm366_vm15 = vcmp.lt.f32.partialorder %v364_v22, 7.0 }
  0x6a   :  { %v372_v30 = vadd.f32 1.0, %v364_v22  ;;  %v216_v32 = vmul.f32 %v214_v20, %v210_v51  ;;  %v228_v33 = vmul.f32 %v780_v16, %v226_v21  ;;  %v367_v35 = vmul.f32 %v363_v19, %v359_v24  ;;  %v1266_v51 = vld [vmem:[#allocation6 + $0x8] sm:$0xff] }
  0x6b   :  { %v368_v36 = vmul.f32 %v364_v22, %v360_v25  ;;  %v229_v38 = vsub.f32 %v227_v26, %v1167_v5  ;;  %v302_v39 = vsel %vm298_vm9, %v300_v23, %v292_v12  ;;  %821 = vlog2.f32 %v311_v27 }
  0x6c   :  { %v808_v37 = vpop.eup %807  ;;  %v373_v41 = vsel %vm365_vm14, %v371_v28, %v363_v19  ;;  %v217_v42 = vadd.f32 0.083333336, %v215_v29  ;;  %823 = vlog2.f32 %v1242_v14  ;;  %v374_v46 = vsel %vm366_vm15, %v372_v30, %v364_v22 }
  0x6d   :  { %v475_v43 = vadd.f32 1e-10, %v129_v31  ;;  %v218_v47 = vadd.f32 0.083333336, %v216_v32  ;;  %v230_v48 = vsub.f32 %v228_v33, %v1173_v7  ;;  %v369_v49 = vsel %vm365_vm14, %v367_v35, %v359_v24 }
  0x6e   :  { %v370_v5 = vsel %vm366_vm15, %v368_v36, %v360_v25  ;;  %v810_v34 = vpop.eup %809  ;;  %v310_v55 = vmul.f32 %v1220_v50, %v302_v39  ;;  %v381_v56 = vadd.f32 1.0, %v373_v41  ;;  %v231_v58 = vadd.f32 0.9189385, %v229_v38 }
  0x6f   :  { %v812_v57 = vpop.eup %811  ;;  %vm375_vm0 = vcmp.lt.f32.partialorder %v373_v41, 7.0  ;;  %v382_v59 = vadd.f32 1.0, %v374_v46  ;;  %v489_v60 = vmin.f32 %v1259_v45, 1000000.0  ;;  %v219_v61 = vmul.f32 %v1203_v40, %v217_v42 }
  0x70   :  { %vm376_vm1 = vcmp.lt.f32.partialorder %v374_v46, 7.0  ;;  %v377_v7 = vmul.f32 %v373_v41, %v369_v49  ;;  %v378_v62 = vmul.f32 %v374_v46, %v370_v5  ;;  %v220_v4 = vmul.f32 %v1207_v44, %v218_v47 }
  0x71   :  { %v814_v63 = vpop.eup %813  ;;  %v232_v52 = vadd.f32 0.9189385, %v230_v48  ;;  %v1272_v6 = vadd.f32 1e-10, %v130_v54  ;;  %825 = vlog2.f32 %v475_v43  ;;  %v312_v11 = vsel %vm308_vm11, %v310_v55, %v302_v39 }
  0x72   :  { %v1274_v10 = vpop.eup %815  ;;  %v383_v12 = vsel %vm375_vm0, %v381_v56, %v373_v41  ;;  %v1282_v40 = vadd.f32 %v241_v8, %v1081_v0  ;;  %v490_v13 = vmin.f32 %v1266_v51, 1000000.0  ;;  %v236_v44 = vmul.f32 0.6931472, %v810_v34 }
  0x73   :  { %v1285_v15 = vpop.eup %817  ;;  %v238_v16 = vmul.f32 0.6931472, %v812_v57  ;;  %v1287_v19 = vmul.f32 0.6931472, %v808_v37  ;;  %v384_v20 = vsel %vm376_vm1, %v382_v59, %v374_v46  ;;  %v233_v21 = vadd.f32 %v231_v58, %v219_v61 }
  0x74   :  { %v379_v50 = vsel %vm375_vm0, %v377_v7, %v369_v49  ;;  %v380_v22 = vsel %vm376_vm1, %v378_v62, %v370_v5  ;;  %v465_v23 = vadd.f32 %v1096_v17, %v129_v31  ;;  %v234_v8 = vadd.f32 %v232_v52, %v220_v4 }
  0x75   :  { %v321_v24 = vmul.f32 %v1274_v10, %v1274_v10  ;;  %827 = vlog2.f32 %v312_v11  ;;  %v391_v25 = vadd.f32 1.0, %v383_v12  ;;  %v1295_v26 = vmul.f32 0.6931472, %v814_v63 }
  0x76   :  { %v820_v1 = vpop.eup %819  ;;  %v322_v27 = vmul.f32 %v1285_v15, %v1285_v15  ;;  %vm385_vm2 = vcmp.lt.f32.partialorder %v383_v12, 7.0  ;;  %v392_v28 = vadd.f32 1.0, %v384_v20  ;;  %vm386_vm3 = vcmp.lt.f32.partialorder %v384_v20, 7.0 }
  0x77   :  { %v387_v29 = vmul.f32 %v383_v12, %v379_v50  ;;  %v388_v30 = vmul.f32 %v384_v20, %v380_v22  ;;  %v466_v32 = vadd.f32 %v1100_v18, %v130_v54  ;;  %v1300_v31 = vsub.f32 %v233_v21, %v236_v44 }
  0x78   :  { %v822_v17 = vpop.eup %821  ;;  %v781_v33 = vadd.f32 -0.5, %v1236_v53  ;;  %v782_v35 = vadd.f32 -0.5, %v1242_v14  ;;  %829 = vlog2.f32 %v465_v23  ;;  %v1304_v37 = vsub.f32 %v234_v8, %v238_v16 }
  0x79   :  { %v824_v36 = vpop.eup %823  ;;  %v323_v38 = vmul.f32 0.0007936508, %v321_v24  ;;  %v336_v39 = vmul.f32 0.6931472, %v820_v1  ;;  %v393_v41 = vsel %vm385_vm2, %v391_v25, %v383_v12  ;;  %v324_v42 = vmul.f32 0.0007936508, %v322_v27 }
  0x7a   :  { %v394_v46 = vsel %vm386_vm3, %v392_v28, %v384_v20  ;;  %v1310_v18 = vadd.f32 1e-10, %v489_v60  ;;  %v1314_v43 = vadd.f32 1e-10, %v490_v13  ;;  %v1316_v47 = vmul.f32 0.6931472, %v822_v17 }
  0x7b   :  { %v389_v48 = vsel %vm385_vm2, %v387_v29, %v379_v50  ;;  %v390_v49 = vsel %vm386_vm3, %v388_v30, %v380_v22  ;;  %831 = vlog2.f32 %v466_v32  ;;  %v338_v5 = vmul.f32 0.6931472, %v824_v36 }
  0x7c   :  { %v401_v34 = vadd.f32 1.0, %v393_v41  ;;  %vm497_vm4 = vcmp.lt.f32.partialorder %v1310_v18, 7.0  ;;  %v501_v54 = vadd.f32 1.0, %v1310_v18  ;;  %v325_v55 = vadd.f32 -0.0027777778, %v323_v38 }
  0x7d   :  { %vm395_vm5 = vcmp.lt.f32.partialorder %v393_v41, 7.0  ;;  %vm396_vm6 = vcmp.lt.f32.partialorder %v394_v46, 7.0  ;;  %vm498_vm7 = vcmp.lt.f32.partialorder %v1314_v43, 7.0  ;;  %v326_v57 = vadd.f32 -0.0027777778, %v324_v42 }
  0x7e   :  { %v826_v56 = vpop.eup %825  ;;  %v339_v58 = vmul.f32 %v781_v33, %v336_v39  ;;  %v502_v59 = vadd.f32 1.0, %v1314_v43  ;;  %v503_v61 = vsel %vm497_vm4, %v501_v54, %v1310_v18  ;;  %v402_v7 = vadd.f32 1.0, %v394_v46 }
  0x7f   :  { %v499_v62 = vsel %vm497_vm4, %v1310_v18, 1.0  ;;  %vm505_vm8 = vcmp.lt.f32.partialorder %v503_v61, 7.0  ;;  %v511_v63 = vadd.f32 1.0, %v503_v61  ;;  %v340_v4 = vmul.f32 %v782_v35, %v338_v5 }
  0x80   :  { %v397_v52 = vmul.f32 %v393_v41, %v389_v48  ;;  %v403_v11 = vsel %vm395_vm5, %v401_v34, %v393_v41  ;;  %v504_v12 = vsel %vm498_vm7, %v502_v59, %v1314_v43  ;;  %v398_v44 = vmul.f32 %v394_v46, %v390_v49 }
  0x81   :  { %v500_v16 = vsel %vm498_vm7, %v1314_v43, 1.0  ;;  %vm506_vm9 = vcmp.lt.f32.partialorder %v504_v12, 7.0  ;;  %v512_v20 = vadd.f32 1.0, %v504_v12  ;;  %v327_v50 = vmul.f32 %v325_v55, %v321_v24 }
  0x82   :  { %v828_v21 = vpop.eup %827  ;;  %v328_v22 = vmul.f32 %v326_v57, %v322_v27  ;;  %v507_v23 = vmul.f32 %v503_v61, %v499_v62  ;;  %v513_v1 = vsel %vm505_vm8, %v511_v63, %v503_v61  ;;  %v404_v8 = vsel %vm396_vm6, %v402_v7, %v394_v46 }
  0x83   :  { %v411_v25 = vadd.f32 1.0, %v403_v11  ;;  %v514_v28 = vsel %vm506_vm9, %v512_v20, %v504_v12  ;;  %vm515_vm10 = vcmp.lt.f32.partialorder %v513_v1, 7.0  ;;  %vm405_vm11 = vcmp.lt.f32.partialorder %v403_v11, 7.0 }
  0x84   :  { %v508_v29 = vmul.f32 %v504_v12, %v500_v16  ;;  %vm516_vm12 = vcmp.lt.f32.partialorder %v514_v28, 7.0  ;;  %v521_v30 = vadd.f32 1.0, %v513_v1  ;;  %v341_v17 = vsub.f32 %v339_v58, %v1236_v53 }
  0x85   :  { %v830_v32 = vpop.eup %829  ;;  %v1333_v33 = vmul.f32 0.6931472, %v828_v21  ;;  %v1335_v24 = vmul.f32 0.6931472, %v826_v56  ;;  %v522_v27 = vadd.f32 1.0, %v514_v28  ;;  %v342_v35 = vsub.f32 %v340_v4, %v1242_v14 }
  0x86   :  { %v399_v36 = vsel %vm395_vm5, %v397_v52, %v389_v48  ;;  %v509_v38 = vsel %vm505_vm8, %v507_v23, %v499_v62  ;;  %v523_v39 = vsel %vm515_vm10, %v521_v30, %v513_v1  ;;  %v400_v42 = vsel %vm396_vm6, %v398_v44, %v390_v49 }
  0x87   :  { %v412_v5 = vadd.f32 1.0, %v404_v8  ;;  %v1343_v34 = vsel %vm405_vm11, %v411_v25, %v403_v11  ;;  %v524_v53 = vsel %vm516_vm12, %v522_v27, %v514_v28  ;;  %v329_v55 = vadd.f32 0.083333336, %v327_v50 }
  0x88   :  { %v1346_v54 = vpop.eup %831  ;;  %v330_v56 = vadd.f32 0.083333336, %v328_v22  ;;  %vm406_vm13 = vcmp.lt.f32.partialorder %v404_v8, 7.0  ;;  %v510_v14 = vsel %vm506_vm9, %v508_v29, %v500_v16  ;;  %v407_v41 = vmul.f32 %v403_v11, %v399_v36 }
  0x89   :  { %v517_v48 = vmul.f32 %v513_v1, %v509_v38  ;;  %vm525_vm14 = vcmp.lt.f32.partialorder %v523_v39, 7.0  ;;  %v531_v57 = vadd.f32 1.0, %v523_v39  ;;  %v343_v58 = vadd.f32 0.9189385, %v341_v17 }
  0x8a   :  { %v344_v46 = vadd.f32 0.9189385, %v342_v35  ;;  %v421_v49 = vadd.f32 1.0, %v1343_v34  ;;  %vm526_vm15 = vcmp.lt.f32.partialorder %v524_v53, 7.0  ;;  %v1351_v59 = vsel %vm406_vm13, %v412_v5, %v404_v8 }
  0x8b   :  { %vm415_vm0 = vcmp.lt.f32.partialorder %v1343_v34, 7.0  ;;  %v518_v61 = vmul.f32 %v514_v28, %v510_v14  ;;  %v532_v7 = vadd.f32 1.0, %v524_v53  ;;  %v331_v62 = vmul.f32 %v1274_v10, %v329_v55 }
  0x8c   :  { %v332_v63 = vmul.f32 %v1285_v15, %v330_v56  ;;  %v408_v4 = vmul.f32 %v404_v8, %v400_v42  ;;  %v533_v52 = vsel %vm525_vm14, %v531_v57, %v523_v39  ;;  %v409_v12 = vsel %vm405_vm11, %v407_v41, %v399_v36 }
  0x8d   :  { %v1358_v44 = vmul.f32 0.6931472, %v830_v32  ;;  %v519_v16 = vsel %vm515_vm10, %v517_v48, %v509_v38  ;;  %v1362_v20 = vsel %vm526_vm15, %v532_v7, %v524_v53  ;;  %vm416_vm1 = vcmp.lt.f32.partialorder %v1351_v59, 7.0 }
  0x8e   :  { %v422_v21 = vadd.f32 1.0, %v1351_v59  ;;  %v1369_v10 = vsel %vm415_vm0, %v421_v49, %v1343_v34  ;;  %833 = vlog2.f32 %v1272_v6  ;;  %v520_v15 = vsel %vm516_vm12, %v518_v61, %v510_v14 }
  0x8f   :  { %vm535_vm2 = vcmp.lt.f32.partialorder %v533_v52, 7.0  ;;  %vm536_vm3 = vcmp.lt.f32.partialorder %v1362_v20, 7.0  ;;  %v603_v11 = vadd.f32 %v1310_v18, %v1081_v0  ;;  %v527_v50 = vmul.f32 %v523_v39, %v519_v16 }
  0x90   :  { %v541_v22 = vadd.f32 1.0, %v533_v52  ;;  %v542_v23 = vadd.f32 1.0, %v1362_v20  ;;  %v604_v1 = vadd.f32 %v1314_v43, %v1087_v3  ;;  %v1379_v25 = vadd.f32 %v343_v58, %v331_v62 }
  0x91   :  { %v1381_v29 = vadd.f32 %v344_v46, %v332_v63  ;;  %v410_v6 = vsel %vm406_vm13, %v408_v4, %v400_v42  ;;  %835 = vrcp.f32 %v1369_v10  ;;  %v1388_v28 = vsel %vm416_vm1, %v422_v21, %v1351_v59 }
  0x92   :  { %v528_v0 = vmul.f32 %v524_v53, %v520_v15  ;;  %v1391_v30 = vsel %vm535_vm2, %v541_v22, %v533_v52  ;;  %v1396_v3 = vsel %vm536_vm3, %v542_v23, %v1362_v20  ;;  %vm605_vm6 = vcmp.lt.f32.partialorder %v603_v11, 7.0 }
  0x93   :  { %vm545_vm4 = vcmp.lt.f32.partialorder %v1391_v30, 7.0  ;;  %vm546_vm5 = vcmp.lt.f32.partialorder %v1396_v3, 7.0  ;;  %v609_v8 = vadd.f32 1.0, %v603_v11  ;;  %v529_v32 = vsel %vm525_vm14, %v527_v50, %v519_v16 }
  0x94   :  { %v551_v17 = vadd.f32 1.0, %v1391_v30  ;;  %v552_v27 = vadd.f32 1.0, %v1396_v3  ;;  %v610_v35 = vadd.f32 1.0, %v604_v1  ;;  %v417_v36 = vmul.f32 %v1343_v34, %v409_v12 }
  0x95   :  { %837 = vrcp.f32 %v1388_v28  ;;  %vm606_vm7 = vcmp.lt.f32.partialorder %v604_v1, 7.0  ;;  %v607_v38 = vsel %vm605_vm6, %v603_v11, 1.0  ;;  %v530_v42 = vsel %vm526_vm15, %v528_v0, %v520_v15 }
  0x96   :  { %v1410_v5 = vsel %vm545_vm4, %v551_v17, %v1391_v30  ;;  %v1415_v39 = vsel %vm546_vm5, %v552_v27, %v1396_v3  ;;  %v608_v55 = vsel %vm606_vm7, %v604_v1, 1.0  ;;  %839 = vlog2.f32 %v1369_v10 }
  0x97   :  { %v537_v56 = vmul.f32 %v533_v52, %v529_v32  ;;  %vm555_vm8 = vcmp.lt.f32.partialorder %v1410_v5, 7.0  ;;  %v611_v14 = vsel %vm605_vm6, %v609_v8, %v603_v11  ;;  %vm556_vm9 = vcmp.lt.f32.partialorder %v1415_v39, 7.0 }
  0x98   :  { %v561_v53 = vadd.f32 1.0, %v1410_v5  ;;  %v562_v41 = vadd.f32 1.0, %v1415_v39  ;;  %v612_v48 = vsel %vm606_vm7, %v610_v35, %v604_v1  ;;  %v418_v57 = vmul.f32 %v1351_v59, %v410_v6 }
  0x99   :  { %v538_v58 = vmul.f32 %v1362_v20, %v530_v42  ;;  %v615_v46 = vmul.f32 %v611_v14, %v607_v38  ;;  %v616_v49 = vmul.f32 %v612_v48, %v608_v55  ;;  %v351_v61 = vsub.f32 %v1379_v25, %v1316_v47 }
  0x9a   :  { %v352_v7 = vsub.f32 %v1381_v29, %v1333_v33  ;;  %841 = vlog2.f32 %v1388_v28  ;;  %v1433_v62 = vsel %vm555_vm8, %v561_v53, %v1410_v5  ;;  %v539_v4 = vsel %vm535_vm2, %v537_v56, %v529_v32  ;;  %v1559_v29 = vld [vmem:[#allocation11] sm:$0xff] }
  0x9b   :  { %v1435_v63 = vpop.eup %833  ;;  %v1441_v16 = vsel %vm556_vm9, %v562_v41, %v1415_v39  ;;  %vm613_vm10 = vcmp.lt.f32.partialorder %v611_v14, 7.0  ;;  %vm614_vm11 = vcmp.lt.f32.partialorder %v612_v48, 7.0  ;;  %v419_v21 = vsel %vm415_vm0, %v417_v36, %v409_v12 }
  0x9c   :  { %v617_v15 = vsel %vm613_vm10, %v615_v46, %v607_v38  ;;  %v619_v11 = vadd.f32 1.0, %v611_v14  ;;  %v620_v50 = vadd.f32 1.0, %v612_v48  ;;  %v420_v22 = vsel %vm416_vm1, %v418_v57, %v410_v6 }
  0x9d   :  { %v540_v52 = vsel %vm536_vm3, %v538_v58, %v530_v42  ;;  %843 = vrcp.f32 %v1433_v62  ;;  %v618_v23 = vsel %vm614_vm11, %v616_v49, %v608_v55  ;;  %v547_v0 = vmul.f32 %v1391_v30, %v539_v4 }
  0x9e   :  { %v1450_v1 = vpop.eup %835  ;;  %845 = vrcp.f32 %v1441_v16  ;;  %v621_v34 = vsel %vm613_vm10, %v619_v11, %v611_v14  ;;  %v622_v12 = vsel %vm614_vm11, %v620_v50, %v612_v48  ;;  %v1455_v8 = vmul.f32 0.6931472, %v1346_v54 }
  0x9f   :  { %vm623_vm12 = vcmp.lt.f32.partialorder %v621_v34, 7.0  ;;  %vm624_vm13 = vcmp.lt.f32.partialorder %v622_v12, 7.0  ;;  %v625_v59 = vmul.f32 %v621_v34, %v617_v15  ;;  %847 = vlog2.f32 %v419_v21 }
  0xa0   :  { %v626_v20 = vmul.f32 %v622_v12, %v618_v23  ;;  %v629_v6 = vadd.f32 1.0, %v621_v34  ;;  %v630_v32 = vadd.f32 1.0, %v622_v12  ;;  %v1459_v17 = vmul.f32 %v1450_v1, %v1450_v1 }
  0xa1   :  { %849 = vlog2.f32 %v420_v22  ;;  %v548_v27 = vmul.f32 %v1396_v3, %v540_v52  ;;  %v627_v35 = vsel %vm623_vm12, %v625_v59, %v617_v15  ;;  %v549_v54 = vsel %vm545_vm4, %v547_v0, %v539_v4 }
  0xa2   :  { %v1462_v36 = vpop.eup %837  ;;  %v628_v38 = vsel %vm624_vm13, %v626_v20, %v618_v23  ;;  %v631_v42 = vsel %vm623_vm12, %v629_v6, %v621_v34  ;;  %v632_v55 = vsel %vm624_vm13, %v630_v32, %v622_v12  ;;  %v783_v41 = vadd.f32 -0.5, %v1369_v10  ;;  %v126_v32 = vld [vmem:[#allocation3 + $0x8] sm:$0xff] }
  0xa3   :  { %vm633_vm14 = vcmp.lt.f32.partialorder %v631_v42, 7.0  ;;  %vm634_vm15 = vcmp.lt.f32.partialorder %v632_v55, 7.0  ;;  %v635_v56 = vmul.f32 %v631_v42, %v627_v35  ;;  %v636_v14 = vmul.f32 %v632_v55, %v628_v38  ;;  %v840_v53 = vpop.eup %839 }
  0xa4   :  { %851 = vlog2.f32 %v1433_v62  ;;  %v639_v48 = vadd.f32 1.0, %v631_v42  ;;  %v640_v57 = vadd.f32 1.0, %v632_v55  ;;  %v1470_v58 = vmul.f32 %v1462_v36, %v1462_v36 }
  0xa5   :  { %v550_v30 = vsel %vm546_vm5, %v548_v27, %v540_v52  ;;  %v557_v46 = vmul.f32 %v1410_v5, %v549_v54  ;;  %v637_v49 = vsel %vm633_vm14, %v635_v56, %v627_v35  ;;  %853 = vlog2.f32 %v1441_v16  ;;  %v125_v52 = vld [vmem:[#allocation3] sm:$0xff] }
  0xa6   :  { %v638_v4 = vsel %vm634_vm15, %v636_v14, %v628_v38  ;;  %v641_v21 = vsel %vm633_vm14, %v639_v48, %v631_v42  ;;  %v642_v15 = vsel %vm634_vm15, %v640_v57, %v632_v55  ;;  %v431_v50 = vmul.f32 0.0007936508, %v1459_v17 }
  0xa7   :  { %v842_v11 = vpop.eup %841  ;;  %v444_v22 = vmul.f32 0.6931472, %v840_v53  ;;  %vm643_vm0 = vcmp.lt.f32.partialorder %v641_v21, 7.0  ;;  %v645_v23 = vmul.f32 %v641_v21, %v637_v49  ;;  %v558_v0 = vmul.f32 %v1415_v39, %v550_v30 }
  0xa8   :  { %vm644_vm1 = vcmp.lt.f32.partialorder %v642_v15, 7.0  ;;  %v649_v34 = vadd.f32 1.0, %v641_v21  ;;  %v650_v3 = vadd.f32 1.0, %v642_v15  ;;  %v1479_v12 = vadd.f32 -0.5, %v1388_v28 }
  0xa9   :  { %855 = vlog2.f32 %v1310_v18  ;;  %v559_v59 = vsel %vm555_vm8, %v557_v46, %v549_v54  ;;  %v646_v20 = vmul.f32 %v642_v15, %v638_v4  ;;  %v432_v27 = vmul.f32 0.0007936508, %v1470_v58 }
  0xaa   :  { %v1484_v6 = vpop.eup %843  ;;  %v446_v35 = vmul.f32 0.6931472, %v842_v11  ;;  %857 = vlog2.f32 %v1314_v43  ;;  %v651_v38 = vsel %vm643_vm0, %v649_v34, %v641_v21  ;;  %v433_v55 = vadd.f32 -0.0027777778, %v431_v50 }
  0xab   :  { %v1489_v42 = vpop.eup %845  ;;  %v1491_v56 = vmul.f32 %v783_v41, %v444_v22  ;;  %v647_v14 = vsel %vm643_vm0, %v645_v23, %v637_v49  ;;  %v652_v5 = vsel %vm644_vm1, %v650_v3, %v642_v15  ;;  %v560_v54 = vsel %vm556_vm9, %v558_v0, %v550_v30 }
  0xac   :  { %859 = vlog2.f32 %v559_v59  ;;  %vm653_vm2 = vcmp.lt.f32.partialorder %v651_v38, 7.0  ;;  %v713_v53 = vadd.f32 %v1310_v18, %v125_v52  ;;  %v1498_v48 = vpop.eup %847  ;;  %v569_v57 = vmul.f32 %v1484_v6, %v1484_v6 }
  0xad   :  { %v648_v46 = vsel %vm644_vm1, %v646_v20, %v638_v4  ;;  %v659_v41 = vadd.f32 1.0, %v651_v38  ;;  %v714_v21 = vadd.f32 %v1314_v43, %v126_v32  ;;  %v570_v39 = vmul.f32 %v1489_v42, %v1489_v42 }
  0xae   :  { %v1504_v49 = vpop.eup %849  ;;  %vm654_vm3 = vcmp.lt.f32.partialorder %v652_v5, 7.0  ;;  %v655_v30 = vmul.f32 %v651_v38, %v647_v14  ;;  %v723_v11 = vadd.f32 1e-10, %v125_v52  ;;  %861 = vlog2.f32 %v560_v54 }
  0xaf   :  { %v660_v18 = vadd.f32 1.0, %v652_v5  ;;  %v661_v50 = vsel %vm653_vm2, %v659_v41, %v651_v38  ;;  %v724_v22 = vadd.f32 1e-10, %v126_v32  ;;  %v434_v23 = vadd.f32 -0.0027777778, %v432_v27 }
  0xb0   :  { %v656_v0 = vmul.f32 %v652_v5, %v648_v46  ;;  %vm663_vm4 = vcmp.lt.f32.partialorder %v661_v50, 7.0  ;;  %863 = vlog2.f32 %v713_v53  ;;  %v571_v15 = vmul.f32 0.0007936508, %v569_v57 }
  0xb1   :  { %v852_v4 = vpop.eup %851  ;;  %v662_v43 = vsel %vm654_vm3, %v660_v18, %v652_v5  ;;  %v669_v34 = vadd.f32 1.0, %v661_v50  ;;  %865 = vlog2.f32 %v714_v21  ;;  %v572_v3 = vmul.f32 0.0007936508, %v570_v39 }
  0xb2   :  { %v657_v59 = vsel %vm653_vm2, %v655_v30, %v647_v14  ;;  %vm664_vm5 = vcmp.lt.f32.partialorder %v662_v43, 7.0  ;;  %867 = vlog2.f32 %v723_v11  ;;  %v854_v52 = vpop.eup %853  ;;  %v435_v20 = vmul.f32 %v433_v55, %v1459_v17 }
  0xb3   :  { %v670_v54 = vadd.f32 1.0, %v662_v43  ;;  %v1513_v32 = vsel %vm663_vm4, %v669_v34, %v661_v50  ;;  %869 = vlog2.f32 %v724_v22  ;;  %v785_v27 = vadd.f32 -0.5, %v1433_v62 }
  0xb4   :  { %v584_v53 = vmul.f32 0.6931472, %v852_v4  ;;  %v658_v41 = vsel %vm654_vm3, %v656_v0, %v648_v46  ;;  %871 = vrcp.f32 %v1513_v32  ;;  %v573_v21 = vadd.f32 -0.0027777778, %v571_v15  ;;  %v1535_v15 = vld [vmem:[#allocation11 + $0x8] sm:$0xff] }
  0xb5   :  { %v665_v38 = vmul.f32 %v661_v50, %v657_v59  ;;  %v1519_v14 = vsel %vm664_vm5, %v670_v54, %v662_v43  ;;  %873 = vlog2.f32 %v1513_v32  ;;  %v574_v55 = vadd.f32 -0.0027777778, %v572_v3 }
  0xb6   :  { %v856_v17 = vpop.eup %855  ;;  %v786_v30 = vadd.f32 -0.5, %v1441_v16  ;;  %v586_v11 = vmul.f32 0.6931472, %v854_v52  ;;  %875 = vrcp.f32 %v1519_v14  ;;  %v436_v5 = vmul.f32 %v434_v23, %v1470_v58 }
  0xb7   :  { %v858_v18 = vpop.eup %857  ;;  %v448_v46 = vmul.f32 %v1479_v12, %v446_v35  ;;  %v666_v22 = vmul.f32 %v662_v43, %v658_v41  ;;  %877 = vlog2.f32 %v1519_v14  ;;  %v1531_v0 = vadd.f32 %v351_v61, %v1300_v31 }
  0xb8   :  { %v449_v4 = vsub.f32 %v1491_v56, %v1369_v10  ;;  %v464_v58 = vadd.f32 %v1535_v15, %v242_v9  ;;  %v471_v12 = vsub.f32 %v1358_v44, %v1287_v19  ;;  %v437_v23 = vadd.f32 0.083333336, %v435_v20 }
  0xb9   :  { %v860_v35 = vpop.eup %859  ;;  %v575_v34 = vmul.f32 %v573_v21, %v569_v57  ;;  %v587_v3 = vmul.f32 %v785_v27, %v584_v53  ;;  %v667_v47 = vsel %vm663_vm4, %v665_v38, %v657_v59  ;;  %v1547_v10 = vadd.f32 %v352_v7, %v1304_v37 }
  0xba   :  { %v472_v2 = vsub.f32 %v1455_v8, %v1295_v26  ;;  %v576_v25 = vmul.f32 %v574_v55, %v570_v39  ;;  %v588_v9 = vmul.f32 %v786_v30, %v586_v11  ;;  %v438_v61 = vadd.f32 0.083333336, %v436_v5 }
  0xbb   :  { %v450_v44 = vsub.f32 %v448_v46, %v1388_v28  ;;  %v481_v56 = vsub.f32 %v1287_v19, %v1335_v24  ;;  %v668_v57 = vsel %vm664_vm5, %v666_v22, %v658_v41  ;;  %v862_v50 = vpop.eup %861  ;;  %v1556_v59 = vmul.f32 %v471_v12, %v1282_v40 }
  0xbc   :  { %v480_v33 = vmul.f32 0.6931472, %v1435_v63  ;;  %879 = vlog2.f32 %v667_v47  ;;  %v1564_v7 = vadd.f32 %v1559_v29, %v489_v60  ;;  %v439_v8 = vmul.f32 %v1450_v1, %v437_v23 }
  0xbd   :  { %v864_v28 = vpop.eup %863  ;;  %v451_v19 = vadd.f32 0.9189385, %v449_v4  ;;  %v577_v24 = vadd.f32 0.083333336, %v575_v34  ;;  %v589_v39 = vsub.f32 %v587_v3, %v1433_v62  ;;  %v1568_v40 = vmul.f32 %v472_v2, %v464_v58 }
  0xbe   :  { %v866_v43 = vpop.eup %865  ;;  %v578_v52 = vadd.f32 0.083333336, %v576_v25  ;;  %v590_v63 = vsub.f32 %v588_v9, %v1441_v16  ;;  %881 = vlog2.f32 %v668_v57  ;;  %v440_v45 = vmul.f32 %v1462_v36, %v438_v61 }
  0xbf   :  { %v868_v20 = vpop.eup %867  ;;  %v452_v54 = vadd.f32 0.9189385, %v450_v44  ;;  %v456_v60 = vmul.f32 0.6931472, %v1498_v48  ;;  %v483_v27 = vmul.f32 %v1559_v29, %v481_v56  ;;  %v1575_v53 = vmul.f32 0.6931472, %v1504_v49 }
  0xc0   :  { %v870_v1 = vpop.eup %869  ;;  %v482_v62 = vsub.f32 %v1295_v26, %v480_v33  ;;  %v494_v41 = vmul.f32 0.6931472, %v856_v17  ;;  %v1578_v21 = vmul.f32 0.6931472, %v858_v18  ;;  %v453_v16 = vadd.f32 %v451_v19, %v439_v8 }
  0xc1   :  { %v872_v38 = vpop.eup %871  ;;  %v579_v55 = vmul.f32 %v1484_v6, %v577_v24  ;;  %v591_v30 = vadd.f32 0.9189385, %v589_v39  ;;  %v787_v36 = vadd.f32 -0.5, %v1513_v32  ;;  %v580_v48 = vmul.f32 %v1489_v42, %v578_v52 }
  0xc2   :  { %v874_v11 = vpop.eup %873  ;;  %v592_v5 = vadd.f32 0.9189385, %v590_v63  ;;  %v677_v46 = vmul.f32 %v872_v38, %v872_v38  ;;  %v716_v22 = vmul.f32 0.6931472, %v864_v28  ;;  %v454_v4 = vadd.f32 %v452_v54, %v440_v45 }
  0xc3   :  { %v876_v49 = vpop.eup %875  ;;  %v788_v26 = vadd.f32 -0.5, %v1519_v14  ;;  %v692_v17 = vmul.f32 0.6931472, %v874_v11  ;;  %v726_v18 = vmul.f32 0.6931472, %v868_v20  ;;  %v593_v3 = vadd.f32 %v591_v30, %v579_v55 }
  0xc4   :  { %v878_v58 = vpop.eup %877  ;;  %v596_v12 = vmul.f32 0.6931472, %v860_v35  ;;  %v598_v23 = vmul.f32 0.6931472, %v862_v50  ;;  %v678_v34 = vmul.f32 %v876_v49, %v876_v49  ;;  %v679_v6 = vmul.f32 0.0007936508, %v677_v46 }
  0xc5   :  { %v694_v47 = vmul.f32 0.6931472, %v878_v58  ;;  %v695_v2 = vmul.f32 %v787_v36, %v692_v17  ;;  %v718_v25 = vmul.f32 0.6931472, %v866_v43  ;;  %v594_v9 = vadd.f32 %v592_v5, %v580_v48 }
  0xc6   :  { %v680_v42 = vmul.f32 0.0007936508, %v678_v34  ;;  %v681_v61 = vadd.f32 -0.0027777778, %v679_v6  ;;  %v728_v44 = vmul.f32 0.6931472, %v870_v1  ;;  %v719_v33 = vsub.f32 %v716_v22, %v494_v41 }
  0xc7   :  { %v696_v56 = vmul.f32 %v788_v26, %v694_v47  ;;  %v697_v57 = vsub.f32 %v695_v2, %v1513_v32  ;;  %v729_v28 = vsub.f32 %v494_v41, %v726_v18  ;;  %v484_v8 = vmul.f32 %v1535_v15, %v482_v62 }
  0xc8   :  { %v682_v19 = vadd.f32 -0.0027777778, %v680_v42  ;;  %v683_v35 = vmul.f32 %v681_v61, %v677_v46  ;;  %v712_v50 = vadd.f32 %v1535_v15, %v490_v13  ;;  %v459_v39 = vsub.f32 %v453_v16, %v456_v60 }
  0xc9   :  { %v880_v24 = vpop.eup %879  ;;  %v599_v43 = vsub.f32 %v593_v3, %v596_v12  ;;  %v698_v52 = vsub.f32 %v696_v56, %v1519_v14  ;;  %v720_v63 = vsub.f32 %v718_v25, %v1578_v21  ;;  %v699_v32 = vadd.f32 0.9189385, %v697_v57 }
  0xca   :  { %v684_v20 = vmul.f32 %v682_v19, %v678_v34  ;;  %v685_v45 = vadd.f32 0.083333336, %v683_v35  ;;  %v730_v54 = vsub.f32 %v1578_v21, %v728_v44  ;;  %v460_v62 = vsub.f32 %v454_v4, %v1575_v53 }
  0xcb   :  { %v882_v1 = vpop.eup %881  ;;  %v600_v41 = vsub.f32 %v594_v9, %v598_v23  ;;  %v721_v51 = vmul.f32 %v719_v33, %v1564_v7  ;;  %v731_v13 = vmul.f32 %v1559_v29, %v729_v28  ;;  %v700_v16 = vadd.f32 0.9189385, %v698_v52 }
  0xcc   :  { %v686_v55 = vadd.f32 0.083333336, %v684_v20  ;;  %v687_v60 = vmul.f32 %v872_v38, %v685_v45  ;;  %v704_v30 = vmul.f32 0.6931472, %v880_v24  ;;  %v461_v14 = vsub.f32 %v1531_v0, %v459_v39 }
  0xcd   :  { %v485_v36 = vadd.f32 %v483_v27, %v1556_v59  ;;  %v601_v11 = vadd.f32 %v599_v43, %v1300_v31  ;;  %v722_v48 = vmul.f32 %v720_v63, %v712_v50  ;;  %v706_v46 = vmul.f32 0.6931472, %v882_v1 }
  0xce   :  { %v688_v21 = vmul.f32 %v876_v49, %v686_v55  ;;  %v701_v5 = vadd.f32 %v699_v32, %v687_v60  ;;  %v732_v53 = vmul.f32 %v1535_v15, %v730_v54  ;;  %v462_v7 = vsub.f32 %v1547_v10, %v460_v62 }
  0xcf   :  { %v486_v29 = vadd.f32 %v484_v8, %v1568_v40  ;;  %v602_v38 = vadd.f32 %v600_v41, %v1304_v37  ;;  %v733_v26 = vadd.f32 %v731_v13, %v721_v51  ;;  %v487_v0 = vadd.f32 %v485_v36, %v461_v14 }
  0xd0   :  { %v702_v22 = vadd.f32 %v700_v16, %v688_v21  ;;  %v707_v4 = vsub.f32 %v701_v5, %v704_v30  ;;  %v734_v27 = vadd.f32 %v732_v53, %v722_v48 }
  0xd1   :  { %v488_v31 = vadd.f32 %v486_v29, %v462_v7 }
  0xd2   :  { %v708_v17 = vsub.f32 %v702_v22, %v706_v46  ;;  %v709_v59 = vsub.f32 %v601_v11, %v707_v4 }
  0xd4   :  { %v710_v18 = vsub.f32 %v602_v38, %v708_v17  ;;  %v735_v49 = vadd.f32 %v733_v26, %v709_v59 }
  0xd6   :  { %v736_v58 = vadd.f32 %v734_v27, %v710_v18  ;;  %v737_v12 = vadd.f32 %v735_v49, %v487_v0 }
  0xd8   :  { %v738_v23 = vadd.f32 %v736_v58, %v488_v31 }
  0xda   :  { %v750_v15 = vadd.f32 %v738_v23, %v737_v12 }
  0xdc   :  { %751 = vadd.xlane.f32.xlu0 %v750_v15 }
 0x165   :  { %v752_v10 = vpop.xlane.xlu0 %751 }
 0x166   :  { %v753_v34 = vrot.slane %v752_v10, 4 }
 0x168   :  { %v754_v40 = vadd.f32 %v753_v34, %v752_v10 }
 0x16a   :  { %v755_v6 = vrot.slane %v754_v40, 2 }
 0x16c   :  { %v756_v37 = vadd.f32 %v755_v6, %v754_v40 }
 0x16e   :  { %v757_v3 = vrot.slane %v756_v37, 1 }
 0x170   :  { %v758_v47 = vadd.f32 %v757_v3, %v756_v37 }
 0x172   :  { %789 = vpush %v758_v47 }
 0x1a3   :  { %s790_s17 = spop %789 }
 0x1a4   :  { %v760_v2 = vstv %s790_s17 }
 0x1a5   :  { %761 = vst [vmem:[#allocation12] sm:$0xff] %v760_v2 }
 0x1a6   :  { %996 = shalt.err (!%p993_p1)
}
 0x1a7   :  { %771 = dma.vmem_to_hbm [thread:$0]  %s769_s4, 128, %s1610_s5, [#allocation5]  }
 0x1a8   :  { %1011 = dma.done.wait [#allocation5], 128  }
 0x1a9   :  { %1012 = vsyncadd [#allocation5], 4294967168 }
 0x1aa   :  { %775 = vsyncpa [#allocation4], 1 }
 0x1ab   :  { %776 = vsyncpa [#allocation7], 1 }
 0x1ac   :  { %777 = vsyncpa [#allocation10], 1 }
 0x1ad   :  { %778 = vsyncpa [#allocation5], 1 }

</bundles_post_ra>
